<compile_context>
chip_gen: v7x
topology: tpu7x:2x2x1
jax: 0.10.0
libtpu: 0.0.40
codegen_flags: <defaults>
</compile_context>

<pallas_src>
import math
import jax
import jax.numpy as jnp
from jax.experimental import pallas as pl
from jax.experimental.pallas import tpu as pltpu

# ---- model hyper-parameters (small, consistent with a TransformerEncoderLayer) ----
B, S, D = 2, 8, 32          # batch, sequence, d_model
H = 4                       # num heads
DH = D // H                 # head dim
FF = 64                     # dim_feedforward
NUM_LAYERS = 2
EPS = 1e-5                  # LayerNorm eps (PyTorch default)
M = B * S                   # fused token rows presented to the MXU


def _layer_norm_fast(x, gamma, beta):
    """Single-pass LayerNorm: sum(x) and sum(x*x) are independent reductions."""
    mean = jnp.mean(x, axis=-1, keepdims=True)
    mean_sq = jnp.mean(x * x, axis=-1, keepdims=True)
    var = mean_sq - mean * mean
    return (x - mean) * jax.lax.rsqrt(var + EPS) * gamma + beta


def _layer_norm_ref(x, gamma, beta):
    mu = jnp.mean(x, axis=-1, keepdims=True)
    var = jnp.mean((x - mu) ** 2, axis=-1, keepdims=True)
    return (x - mu) * jax.lax.rsqrt(var + EPS) * gamma + beta


# ---------------------------------------------------------------------------
# Fused Pallas kernel: all NUM_LAYERS encoder layers + per-layer outer norm.
# Single program (no grid); every operand lives in VMEM for the whole call.
# ---------------------------------------------------------------------------
def encoder_kernel(x_ref, bias_ref, wqkv_ref, bqkv_ref, wo_ref, w1_ref, b1_ref,
                   w2_ref, vecd_ref, norm_ref, o_ref):
    x = x_ref[...]                                            # (M, D) f32
    bias = bias_ref[...]                                      # (M, M) additive mask

    norm = norm_ref[...]                                      # (2, D)
    gn, bn = norm[0:1, :], norm[1:2, :]

    for l in range(NUM_LAYERS):                               # static unroll (L small)
        wqkv = wqkv_ref[l]                                    # (D, 3D)  scale folded into q cols
        bqkv = bqkv_ref[l]                                    # (1, 3D)
        wo   = wo_ref[l]                                      # (D, D)
        w1   = w1_ref[l]                                      # (D, FF)
        b1   = b1_ref[l]                                      # (1, FF)
        w2   = w2_ref[l]                                      # (FF, D)
        vecd = vecd_ref[l]                                    # (6, D)
        bo,  b2  = vecd[0:1, :], vecd[1:2, :]
        g1,  be1 = vecd[2:3, :], vecd[3:4, :]
        g2,  be2 = vecd[4:5, :], vecd[5:6, :]

        # ---- fused QKV projection: one MXU push with N = 3*D = 96 ----
        qkv = jnp.dot(x, wqkv, preferred_element_type=jnp.float32) + bqkv   # (M, 3D)

        # ---- per-head attention (H=4 static unroll; scores/ctx are inherently
        #      per-head MXU ops, so the loop costs no extra pushes) ----
        ctx_heads = []
        for h in range(H):
            qh = qkv[:,         h * DH:        (h + 1) * DH]  # (M, DH)  (pre-scaled)
            kh = qkv[:,     D + h * DH:     D + (h + 1) * DH]
            vh = qkv[:, 2 * D + h * DH: 2 * D + (h + 1) * DH]
            s = jax.lax.dot_general(qh, kh, (((1,), (1,)), ((), ())),
                                    preferred_element_type=jnp.float32)    # (M, M)
            s = s + bias                                      # block-diag mask bias
            s = s - jnp.max(s, axis=-1, keepdims=True)
            p = jnp.exp(s)
            p = p * pl.reciprocal(jnp.sum(p, axis=-1, keepdims=True), approx=True)
            ctx_heads.append(jnp.dot(p, vh, preferred_element_type=jnp.float32))
        ctx = jnp.concatenate(ctx_heads, axis=-1)             # (M, D)

        # ---- single output projection: K = D = 32 instead of 4x K=8 + head-sum ----
        attn = jnp.dot(ctx, wo, preferred_element_type=jnp.float32) + bo   # (M, D)

        # ---- residual + norm1 (post-norm, PyTorch default) ----
        x1 = _layer_norm_fast(x + attn, g1, be1)

        # ---- feed-forward (ReLU) + residual + norm2 ----
        h1 = jnp.maximum(jnp.dot(x1, w1, preferred_element_type=jnp.float32) + b1, 0.0)
        h2 = jnp.dot(h1, w2, preferred_element_type=jnp.float32) + b2
        x2 = _layer_norm_fast(x1 + h2, g2, be2)

        # ---- encoder-level norm after EVERY layer (matches the given forward) ----
        x = _layer_norm_fast(x2, gn, bn)

    o_ref[...] = x.astype(o_ref.dtype)


# ---------------------------------------------------------------------------
# Host-side parameter packing (runs once, outside the kernel).
# All trailing dims are lane-dense (>= D); 1/sqrt(DH) folded into Wq / bq.
# ---------------------------------------------------------------------------
def pack_params(layers, norm_p):
    scale = 1.0 / math.sqrt(DH)
    w_qkv = jnp.stack([jnp.concatenate([p["wq"] * scale, p["wk"], p["wv"]], axis=1)
                       for p in layers])                                     # (L, D, 3D)
    b_qkv = jnp.stack([jnp.concatenate([p["bq"] * scale, p["bk"], p["bv"]]
                                       ).reshape(1, 3 * D) for p in layers])# (L, 1, 3D)
    w_o  = jnp.stack([p["wo"] for p in layers])                              # (L, D, D)
    w_1  = jnp.stack([p["w1"] for p in layers])                              # (L, D, FF)
    b_1  = jnp.stack([p["b1"].reshape(1, FF) for p in layers])               # (L, 1, FF)
    w_2  = jnp.stack([p["w2"] for p in layers])                              # (L, FF, D)
    vec_d = jnp.stack([jnp.stack([p["bo"], p["b2"], p["g1"], p["be1"],
                                  p["g2"], p["be2"]]) for p in layers])      # (L, 6, D)
    norm = jnp.stack([norm_p["gn"], norm_p["bn"]])                           # (2, D)
    return w_qkv, b_qkv, w_o, w_1, b_1, w_2, vec_d, norm


def make_attn_bias():
    """Additive 0 / -1e30 bias: token i attends to token j iff same sequence."""
    seq_id = jnp.arange(M, dtype=jnp.int32) // S
    same = seq_id[:, None] == seq_id[None, :]
    return jnp.where(same, 0.0, -1e30).astype(jnp.float32)                   # (M, M)


def transformer_encoder_pallas(x, packed, attn_bias):
    """x: (B, S, D) batch-first.  Single fused pallas_call over all layers."""
    x2d = x.reshape(M, D)
    args = (x2d, attn_bias) + tuple(packed)
    out2d = pl.pallas_call(
        encoder_kernel,
        out_shape=jax.ShapeDtypeStruct((M, D), jnp.float32),
        in_specs=[pl.BlockSpec(memory_space=pltpu.MemorySpace.VMEM) for _ in args],
        out_specs=pl.BlockSpec(memory_space=pltpu.MemorySpace.VMEM),
    )(*args)
    return out2d.reshape(B, S, D)


# ---------------------------------------------------------------------------
# Pure-JAX reference (same math, unpacked params) for correctness check.
# ---------------------------------------------------------------------------
def _ref_layer(x, p, norm_p):
    q = x @ p["wq"] + p["bq"]
    k = x @ p["wk"] + p["bk"]
    v = x @ p["wv"] + p["bv"]
    scale = 1.0 / math.sqrt(DH)
    heads = []
    for h in range(H):
        qh = q[..., h * DH:(h + 1) * DH]
        kh = k[..., h * DH:(h + 1) * DH]
        vh = v[..., h * DH:(h + 1) * DH]
        s = jnp.einsum("bqd,bkd->bqk", qh, kh) * scale
        a = jax.nn.softmax(s, axis=-1)
        heads.append(jnp.einsum("bqk,bkd->bqd", a, vh))
    attn = jnp.concatenate(heads, axis=-1) @ p["wo"] + p["bo"]
    x1 = _layer_norm_ref(x + attn, p["g1"], p["be1"])
    h1 = jnp.maximum(x1 @ p["w1"] + p["b1"], 0.0)
    x2 = _layer_norm_ref(x1 + h1 @ p["w2"] + p["b2"], p["g2"], p["be2"])
    return _layer_norm_ref(x2, norm_p["gn"], norm_p["bn"])


def _ref_encoder(x, layers, norm_p):
    out = x
    for layer_p in layers:
        out = _ref_layer(out, layer_p, norm_p)
    return out


# ---------------------------------------------------------------------------
# Deterministic synthetic parameter init.
# ---------------------------------------------------------------------------
def init_layer_params(key):
    ks = jax.random.split(key, 12)
    n = lambda k, shp, s=0.05: jax.random.normal(k, shp, jnp.float32) * s
    return dict(
        wq=n(ks[0], (D, D)), wk=n(ks[1], (D, D)), wv=n(ks[2], (D, D)),
        bq=n(ks[3], (D,), 0.01), bk=n(ks[4], (D,), 0.01), bv=n(ks[5], (D,), 0.01),
        wo=n(ks[6], (D, D)), bo=n(ks[7], (D,), 0.01),
        w1=n(ks[8], (D, FF)), b1=n(ks[9], (FF,), 0.01),
        w2=n(ks[10], (FF, D)), b2=n(ks[11], (D,), 0.01),
        g1=jnp.ones((D,), jnp.float32), be1=jnp.zeros((D,), jnp.float32),
        g2=jnp.ones((D,), jnp.float32), be2=jnp.zeros((D,), jnp.float32),
    )


if __name__ == "__main__":
    key = jax.random.PRNGKey(0)
    k_x, *k_layers = jax.random.split(key, NUM_LAYERS + 1)

    x = jax.random.normal(k_x, (B, S, D), jnp.float32)
    layers = [init_layer_params(k) for k in k_layers]
    norm_p = dict(gn=jnp.ones((D,), jnp.float32), bn=jnp.zeros((D,), jnp.float32))

    packed = pack_params(layers, norm_p)
    attn_bias = make_attn_bias()
    out = jax.block_until_ready(transformer_encoder_pallas(x, packed, attn_bias))

    ref = jax.block_until_ready(_ref_encoder(x, layers, norm_p))
    assert out.shape == (B, S, D)
    # Tolerance accommodates the approximate EUP reciprocal in the softmax denom.
    err = float(jnp.max(jnp.abs(out - ref)))
    assert err < 1e-2, f"mismatch vs JAX reference: max|diff|={err}"

    print("KERNEL_OK")
</pallas_src>

<mosaic_0001>
module attributes {stable_mosaic.version = 11 : i64} {
  func.func @encoder_kernel(%arg0: memref<16x32xf32, #tpu.memory_space<vmem>>, %arg1: memref<16x16xf32, #tpu.memory_space<vmem>>, %arg2: memref<2x32x96xf32, #tpu.memory_space<vmem>>, %arg3: memref<2x1x96xf32, #tpu.memory_space<vmem>>, %arg4: memref<2x32x32xf32, #tpu.memory_space<vmem>>, %arg5: memref<2x32x64xf32, #tpu.memory_space<vmem>>, %arg6: memref<2x1x64xf32, #tpu.memory_space<vmem>>, %arg7: memref<2x64x32xf32, #tpu.memory_space<vmem>>, %arg8: memref<2x6x32xf32, #tpu.memory_space<vmem>>, %arg9: memref<2x32xf32, #tpu.memory_space<vmem>>, %arg10: memref<16x32xf32, #tpu.memory_space<vmem>>) attributes {dimension_semantics = [], scalar_prefetch = 0 : i64, scratch_operands = 0 : i64, tpu.core_type = #tpu.core_type<tc>} {
    %c0 = arith.constant 0 : index
    %c0_0 = arith.constant 0 : index
    %0 = vector.load %arg0[%c0, %c0_0] : memref<16x32xf32, #tpu.memory_space<vmem>>, vector<16x32xf32>
    %c0_1 = arith.constant 0 : index
    %c0_2 = arith.constant 0 : index
    %1 = vector.load %arg1[%c0_1, %c0_2] : memref<16x16xf32, #tpu.memory_space<vmem>>, vector<16x16xf32>
    %c0_3 = arith.constant 0 : index
    %c0_4 = arith.constant 0 : index
    %2 = vector.load %arg9[%c0_3, %c0_4] : memref<2x32xf32, #tpu.memory_space<vmem>>, vector<2x32xf32>
    %3 = vector.extract_strided_slice %2 {offsets = [0, 0], sizes = [1, 32], strides = [1, 1]} : vector<2x32xf32> to vector<1x32xf32>
    %4 = vector.extract_strided_slice %2 {offsets = [1, 0], sizes = [1, 32], strides = [1, 1]} : vector<2x32xf32> to vector<1x32xf32>
    %c0_5 = arith.constant 0 : index
    %c0_6 = arith.constant 0 : index
    %c0_7 = arith.constant 0 : index
    %5 = vector.load %arg2[%c0_5, %c0_6, %c0_7] : memref<2x32x96xf32, #tpu.memory_space<vmem>>, vector<1x32x96xf32>
    %6 = vector.shape_cast %5 : vector<1x32x96xf32> to vector<32x96xf32>
    %c0_8 = arith.constant 0 : index
    %c0_9 = arith.constant 0 : index
    %c0_10 = arith.constant 0 : index
    %7 = vector.load %arg3[%c0_8, %c0_9, %c0_10] : memref<2x1x96xf32, #tpu.memory_space<vmem>>, vector<1x1x96xf32>
    %8 = vector.shape_cast %7 : vector<1x1x96xf32> to vector<1x96xf32>
    %c0_11 = arith.constant 0 : index
    %c0_12 = arith.constant 0 : index
    %c0_13 = arith.constant 0 : index
    %9 = vector.load %arg4[%c0_11, %c0_12, %c0_13] : memref<2x32x32xf32, #tpu.memory_space<vmem>>, vector<1x32x32xf32>
    %10 = vector.shape_cast %9 : vector<1x32x32xf32> to vector<32x32xf32>
    %c0_14 = arith.constant 0 : index
    %c0_15 = arith.constant 0 : index
    %c0_16 = arith.constant 0 : index
    %11 = vector.load %arg5[%c0_14, %c0_15, %c0_16] : memref<2x32x64xf32, #tpu.memory_space<vmem>>, vector<1x32x64xf32>
    %12 = vector.shape_cast %11 : vector<1x32x64xf32> to vector<32x64xf32>
    %c0_17 = arith.constant 0 : index
    %c0_18 = arith.constant 0 : index
    %c0_19 = arith.constant 0 : index
    %13 = vector.load %arg6[%c0_17, %c0_18, %c0_19] : memref<2x1x64xf32, #tpu.memory_space<vmem>>, vector<1x1x64xf32>
    %14 = vector.shape_cast %13 : vector<1x1x64xf32> to vector<1x64xf32>
    %c0_20 = arith.constant 0 : index
    %c0_21 = arith.constant 0 : index
    %c0_22 = arith.constant 0 : index
    %15 = vector.load %arg7[%c0_20, %c0_21, %c0_22] : memref<2x64x32xf32, #tpu.memory_space<vmem>>, vector<1x64x32xf32>
    %16 = vector.shape_cast %15 : vector<1x64x32xf32> to vector<64x32xf32>
    %c0_23 = arith.constant 0 : index
    %c0_24 = arith.constant 0 : index
    %c0_25 = arith.constant 0 : index
    %17 = vector.load %arg8[%c0_23, %c0_24, %c0_25] : memref<2x6x32xf32, #tpu.memory_space<vmem>>, vector<1x6x32xf32>
    %18 = vector.shape_cast %17 : vector<1x6x32xf32> to vector<6x32xf32>
    %19 = vector.extract_strided_slice %18 {offsets = [0, 0], sizes = [1, 32], strides = [1, 1]} : vector<6x32xf32> to vector<1x32xf32>
    %20 = vector.extract_strided_slice %18 {offsets = [1, 0], sizes = [1, 32], strides = [1, 1]} : vector<6x32xf32> to vector<1x32xf32>
    %21 = vector.extract_strided_slice %18 {offsets = [2, 0], sizes = [1, 32], strides = [1, 1]} : vector<6x32xf32> to vector<1x32xf32>
    %22 = vector.extract_strided_slice %18 {offsets = [3, 0], sizes = [1, 32], strides = [1, 1]} : vector<6x32xf32> to vector<1x32xf32>
    %23 = vector.extract_strided_slice %18 {offsets = [4, 0], sizes = [1, 32], strides = [1, 1]} : vector<6x32xf32> to vector<1x32xf32>
    %24 = vector.extract_strided_slice %18 {offsets = [5, 0], sizes = [1, 32], strides = [1, 1]} : vector<6x32xf32> to vector<1x32xf32>
    %cst = arith.constant dense<0.000000e+00> : vector<16x96xf32>
    %25 = tpu.matmul %0, %6, %cst {dimension_numbers = #tpu.dot_dimension_numbers<[1], [0], [0], [1], [0, 0, 1, 1], [], []>} : vector<16x32xf32>, vector<32x96xf32>, vector<16x96xf32> -> vector<16x96xf32>
    %26 = vector.broadcast %8 : vector<1x96xf32> to vector<16x96xf32>
    %27 = arith.addf %25, %26 : vector<16x96xf32>
    %28 = vector.extract_strided_slice %27 {offsets = [0, 0], sizes = [16, 8], strides = [1, 1]} : vector<16x96xf32> to vector<16x8xf32>
    %29 = vector.extract_strided_slice %27 {offsets = [0, 32], sizes = [16, 8], strides = [1, 1]} : vector<16x96xf32> to vector<16x8xf32>
    %30 = vector.extract_strided_slice %27 {offsets = [0, 64], sizes = [16, 8], strides = [1, 1]} : vector<16x96xf32> to vector<16x8xf32>
    %cst_26 = arith.constant dense<0.000000e+00> : vector<16x16xf32>
    %31 = tpu.matmul %28, %29, %cst_26 {dimension_numbers = #tpu.dot_dimension_numbers<[1], [1], [0], [0], [0, 0, 1, 0], [], []>} : vector<16x8xf32>, vector<16x8xf32>, vector<16x16xf32> -> vector<16x16xf32>
    %32 = arith.addf %31, %1 : vector<16x16xf32>
    %cst_27 = arith.constant dense<0xFF800000> : vector<16xf32>
    %33 = vector.multi_reduction <maximumf>, %32, %cst_27 [1] : vector<16x16xf32> to vector<16xf32>
    %34 = vector.shape_cast %33 : vector<16xf32> to vector<16x1xf32>
    %35 = vector.broadcast %34 : vector<16x1xf32> to vector<16x16xf32>
    %36 = arith.subf %32, %35 : vector<16x16xf32>
    %37 = math.exp %36 : vector<16x16xf32>
    %cst_28 = arith.constant dense<0.000000e+00> : vector<16xf32>
    %38 = vector.multi_reduction <add>, %37, %cst_28 [1] : vector<16x16xf32> to vector<16xf32>
    %39 = vector.shape_cast %38 : vector<16xf32> to vector<16x1xf32>
    %40 = tpu.reciprocal %39 {approx = true} : vector<16x1xf32> -> vector<16x1xf32>
    %41 = vector.broadcast %40 : vector<16x1xf32> to vector<16x16xf32>
    %42 = arith.mulf %37, %41 : vector<16x16xf32>
    %cst_29 = arith.constant dense<0.000000e+00> : vector<16x8xf32>
    %43 = tpu.matmul %42, %30, %cst_29 {dimension_numbers = #tpu.dot_dimension_numbers<[1], [0], [0], [1], [0, 0, 1, 1], [], []>} : vector<16x16xf32>, vector<16x8xf32>, vector<16x8xf32> -> vector<16x8xf32>
    %44 = vector.extract_strided_slice %27 {offsets = [0, 8], sizes = [16, 8], strides = [1, 1]} : vector<16x96xf32> to vector<16x8xf32>
    %45 = vector.extract_strided_slice %27 {offsets = [0, 40], sizes = [16, 8], strides = [1, 1]} : vector<16x96xf32> to vector<16x8xf32>
    %46 = vector.extract_strided_slice %27 {offsets = [0, 72], sizes = [16, 8], strides = [1, 1]} : vector<16x96xf32> to vector<16x8xf32>
    %cst_30 = arith.constant dense<0.000000e+00> : vector<16x16xf32>
    %47 = tpu.matmul %44, %45, %cst_30 {dimension_numbers = #tpu.dot_dimension_numbers<[1], [1], [0], [0], [0, 0, 1, 0], [], []>} : vector<16x8xf32>, vector<16x8xf32>, vector<16x16xf32> -> vector<16x16xf32>
    %48 = arith.addf %47, %1 : vector<16x16xf32>
    %cst_31 = arith.constant dense<0xFF800000> : vector<16xf32>
    %49 = vector.multi_reduction <maximumf>, %48, %cst_31 [1] : vector<16x16xf32> to vector<16xf32>
    %50 = vector.shape_cast %49 : vector<16xf32> to vector<16x1xf32>
    %51 = vector.broadcast %50 : vector<16x1xf32> to vector<16x16xf32>
    %52 = arith.subf %48, %51 : vector<16x16xf32>
    %53 = math.exp %52 : vector<16x16xf32>
    %cst_32 = arith.constant dense<0.000000e+00> : vector<16xf32>
    %54 = vector.multi_reduction <add>, %53, %cst_32 [1] : vector<16x16xf32> to vector<16xf32>
    %55 = vector.shape_cast %54 : vector<16xf32> to vector<16x1xf32>
    %56 = tpu.reciprocal %55 {approx = true} : vector<16x1xf32> -> vector<16x1xf32>
    %57 = vector.broadcast %56 : vector<16x1xf32> to vector<16x16xf32>
    %58 = arith.mulf %53, %57 : vector<16x16xf32>
    %cst_33 = arith.constant dense<0.000000e+00> : vector<16x8xf32>
    %59 = tpu.matmul %58, %46, %cst_33 {dimension_numbers = #tpu.dot_dimension_numbers<[1], [0], [0], [1], [0, 0, 1, 1], [], []>} : vector<16x16xf32>, vector<16x8xf32>, vector<16x8xf32> -> vector<16x8xf32>
    %60 = vector.extract_strided_slice %27 {offsets = [0, 16], sizes = [16, 8], strides = [1, 1]} : vector<16x96xf32> to vector<16x8xf32>
    %61 = vector.extract_strided_slice %27 {offsets = [0, 48], sizes = [16, 8], strides = [1, 1]} : vector<16x96xf32> to vector<16x8xf32>
    %62 = vector.extract_strided_slice %27 {offsets = [0, 80], sizes = [16, 8], strides = [1, 1]} : vector<16x96xf32> to vector<16x8xf32>
    %cst_34 = arith.constant dense<0.000000e+00> : vector<16x16xf32>
    %63 = tpu.matmul %60, %61, %cst_34 {dimension_numbers = #tpu.dot_dimension_numbers<[1], [1], [0], [0], [0, 0, 1, 0], [], []>} : vector<16x8xf32>, vector<16x8xf32>, vector<16x16xf32> -> vector<16x16xf32>
    %64 = arith.addf %63, %1 : vector<16x16xf32>
    %cst_35 = arith.constant dense<0xFF800000> : vector<16xf32>
    %65 = vector.multi_reduction <maximumf>, %64, %cst_35 [1] : vector<16x16xf32> to vector<16xf32>
    %66 = vector.shape_cast %65 : vector<16xf32> to vector<16x1xf32>
    %67 = vector.broadcast %66 : vector<16x1xf32> to vector<16x16xf32>
    %68 = arith.subf %64, %67 : vector<16x16xf32>
    %69 = math.exp %68 : vector<16x16xf32>
    %cst_36 = arith.constant dense<0.000000e+00> : vector<16xf32>
    %70 = vector.multi_reduction <add>, %69, %cst_36 [1] : vector<16x16xf32> to vector<16xf32>
    %71 = vector.shape_cast %70 : vector<16xf32> to vector<16x1xf32>
    %72 = tpu.reciprocal %71 {approx = true} : vector<16x1xf32> -> vector<16x1xf32>
    %73 = vector.broadcast %72 : vector<16x1xf32> to vector<16x16xf32>
    %74 = arith.mulf %69, %73 : vector<16x16xf32>
    %cst_37 = arith.constant dense<0.000000e+00> : vector<16x8xf32>
    %75 = tpu.matmul %74, %62, %cst_37 {dimension_numbers = #tpu.dot_dimension_numbers<[1], [0], [0], [1], [0, 0, 1, 1], [], []>} : vector<16x16xf32>, vector<16x8xf32>, vector<16x8xf32> -> vector<16x8xf32>
    %76 = vector.extract_strided_slice %27 {offsets = [0, 24], sizes = [16, 8], strides = [1, 1]} : vector<16x96xf32> to vector<16x8xf32>
    %77 = vector.extract_strided_slice %27 {offsets = [0, 56], sizes = [16, 8], strides = [1, 1]} : vector<16x96xf32> to vector<16x8xf32>
    %78 = vector.extract_strided_slice %27 {offsets = [0, 88], sizes = [16, 8], strides = [1, 1]} : vector<16x96xf32> to vector<16x8xf32>
    %cst_38 = arith.constant dense<0.000000e+00> : vector<16x16xf32>
    %79 = tpu.matmul %76, %77, %cst_38 {dimension_numbers = #tpu.dot_dimension_numbers<[1], [1], [0], [0], [0, 0, 1, 0], [], []>} : vector<16x8xf32>, vector<16x8xf32>, vector<16x16xf32> -> vector<16x16xf32>
    %80 = arith.addf %79, %1 : vector<16x16xf32>
    %cst_39 = arith.constant dense<0xFF800000> : vector<16xf32>
    %81 = vector.multi_reduction <maximumf>, %80, %cst_39 [1] : vector<16x16xf32> to vector<16xf32>
    %82 = vector.shape_cast %81 : vector<16xf32> to vector<16x1xf32>
    %83 = vector.broadcast %82 : vector<16x1xf32> to vector<16x16xf32>
    %84 = arith.subf %80, %83 : vector<16x16xf32>
    %85 = math.exp %84 : vector<16x16xf32>
    %cst_40 = arith.constant dense<0.000000e+00> : vector<16xf32>
    %86 = vector.multi_reduction <add>, %85, %cst_40 [1] : vector<16x16xf32> to vector<16xf32>
    %87 = vector.shape_cast %86 : vector<16xf32> to vector<16x1xf32>
    %88 = tpu.reciprocal %87 {approx = true} : vector<16x1xf32> -> vector<16x1xf32>
    %89 = vector.broadcast %88 : vector<16x1xf32> to vector<16x16xf32>
    %90 = arith.mulf %85, %89 : vector<16x16xf32>
    %cst_41 = arith.constant dense<0.000000e+00> : vector<16x8xf32>
    %91 = tpu.matmul %90, %78, %cst_41 {dimension_numbers = #tpu.dot_dimension_numbers<[1], [0], [0], [1], [0, 0, 1, 1], [], []>} : vector<16x16xf32>, vector<16x8xf32>, vector<16x8xf32> -> vector<16x8xf32>
    %92 = tpu.concatenate %43, %59, %75, %91 in 1 : vector<16x8xf32>, vector<16x8xf32>, vector<16x8xf32>, vector<16x8xf32> -> vector<16x32xf32>
    %cst_42 = arith.constant dense<0.000000e+00> : vector<16x32xf32>
    %93 = tpu.matmul %92, %10, %cst_42 {dimension_numbers = #tpu.dot_dimension_numbers<[1], [0], [0], [1], [0, 0, 1, 1], [], []>} : vector<16x32xf32>, vector<32x32xf32>, vector<16x32xf32> -> vector<16x32xf32>
    %94 = vector.broadcast %19 : vector<1x32xf32> to vector<16x32xf32>
    %95 = arith.addf %93, %94 : vector<16x32xf32>
    %96 = arith.addf %0, %95 : vector<16x32xf32>
    %cst_43 = arith.constant dense<0.000000e+00> : vector<16xf32>
    %97 = vector.multi_reduction <add>, %96, %cst_43 [1] : vector<16x32xf32> to vector<16xf32>
    %98 = vector.shape_cast %97 : vector<16xf32> to vector<16x1xf32>
    %cst_44 = arith.constant 3.200000e+01 : f32
    %99 = vector.broadcast %cst_44 : f32 to vector<16x1xf32>
    %100 = arith.divf %98, %99 : vector<16x1xf32>
    %101 = arith.mulf %96, %96 : vector<16x32xf32>
    %cst_45 = arith.constant dense<0.000000e+00> : vector<16xf32>
    %102 = vector.multi_reduction <add>, %101, %cst_45 [1] : vector<16x32xf32> to vector<16xf32>
    %103 = vector.shape_cast %102 : vector<16xf32> to vector<16x1xf32>
    %cst_46 = arith.constant 3.200000e+01 : f32
    %104 = vector.broadcast %cst_46 : f32 to vector<16x1xf32>
    %105 = arith.divf %103, %104 : vector<16x1xf32>
    %106 = arith.mulf %100, %100 : vector<16x1xf32>
    %107 = arith.subf %105, %106 : vector<16x1xf32>
    %108 = vector.broadcast %100 : vector<16x1xf32> to vector<16x32xf32>
    %109 = arith.subf %96, %108 : vector<16x32xf32>
    %cst_47 = arith.constant 9.99999974E-6 : f32
    %110 = vector.broadcast %cst_47 : f32 to vector<16x1xf32>
    %111 = arith.addf %107, %110 : vector<16x1xf32>
    %112 = math.rsqrt %111 : vector<16x1xf32>
    %113 = vector.broadcast %112 : vector<16x1xf32> to vector<16x32xf32>
    %114 = arith.mulf %109, %113 : vector<16x32xf32>
    %115 = vector.broadcast %21 : vector<1x32xf32> to vector<16x32xf32>
    %116 = arith.mulf %114, %115 : vector<16x32xf32>
    %117 = vector.broadcast %22 : vector<1x32xf32> to vector<16x32xf32>
    %118 = arith.addf %116, %117 : vector<16x32xf32>
    %cst_48 = arith.constant dense<0.000000e+00> : vector<16x64xf32>
    %119 = tpu.matmul %118, %12, %cst_48 {dimension_numbers = #tpu.dot_dimension_numbers<[1], [0], [0], [1], [0, 0, 1, 1], [], []>} : vector<16x32xf32>, vector<32x64xf32>, vector<16x64xf32> -> vector<16x64xf32>
    %120 = vector.broadcast %14 : vector<1x64xf32> to vector<16x64xf32>
    %121 = arith.addf %119, %120 : vector<16x64xf32>
    %cst_49 = arith.constant 0.000000e+00 : f32
    %122 = vector.broadcast %cst_49 : f32 to vector<16x64xf32>
    %123 = arith.maximumf %121, %122 : vector<16x64xf32>
    %cst_50 = arith.constant dense<0.000000e+00> : vector<16x32xf32>
    %124 = tpu.matmul %123, %16, %cst_50 {dimension_numbers = #tpu.dot_dimension_numbers<[1], [0], [0], [1], [0, 0, 1, 1], [], []>} : vector<16x64xf32>, vector<64x32xf32>, vector<16x32xf32> -> vector<16x32xf32>
    %125 = vector.broadcast %20 : vector<1x32xf32> to vector<16x32xf32>
    %126 = arith.addf %124, %125 : vector<16x32xf32>
    %127 = arith.addf %118, %126 : vector<16x32xf32>
    %cst_51 = arith.constant dense<0.000000e+00> : vector<16xf32>
    %128 = vector.multi_reduction <add>, %127, %cst_51 [1] : vector<16x32xf32> to vector<16xf32>
    %129 = vector.shape_cast %128 : vector<16xf32> to vector<16x1xf32>
    %cst_52 = arith.constant 3.200000e+01 : f32
    %130 = vector.broadcast %cst_52 : f32 to vector<16x1xf32>
    %131 = arith.divf %129, %130 : vector<16x1xf32>
    %132 = arith.mulf %127, %127 : vector<16x32xf32>
    %cst_53 = arith.constant dense<0.000000e+00> : vector<16xf32>
    %133 = vector.multi_reduction <add>, %132, %cst_53 [1] : vector<16x32xf32> to vector<16xf32>
    %134 = vector.shape_cast %133 : vector<16xf32> to vector<16x1xf32>
    %cst_54 = arith.constant 3.200000e+01 : f32
    %135 = vector.broadcast %cst_54 : f32 to vector<16x1xf32>
    %136 = arith.divf %134, %135 : vector<16x1xf32>
    %137 = arith.mulf %131, %131 : vector<16x1xf32>
    %138 = arith.subf %136, %137 : vector<16x1xf32>
    %139 = vector.broadcast %131 : vector<16x1xf32> to vector<16x32xf32>
    %140 = arith.subf %127, %139 : vector<16x32xf32>
    %cst_55 = arith.constant 9.99999974E-6 : f32
    %141 = vector.broadcast %cst_55 : f32 to vector<16x1xf32>
    %142 = arith.addf %138, %141 : vector<16x1xf32>
    %143 = math.rsqrt %142 : vector<16x1xf32>
    %144 = vector.broadcast %143 : vector<16x1xf32> to vector<16x32xf32>
    %145 = arith.mulf %140, %144 : vector<16x32xf32>
    %146 = vector.broadcast %23 : vector<1x32xf32> to vector<16x32xf32>
    %147 = arith.mulf %145, %146 : vector<16x32xf32>
    %148 = vector.broadcast %24 : vector<1x32xf32> to vector<16x32xf32>
    %149 = arith.addf %147, %148 : vector<16x32xf32>
    %cst_56 = arith.constant dense<0.000000e+00> : vector<16xf32>
    %150 = vector.multi_reduction <add>, %149, %cst_56 [1] : vector<16x32xf32> to vector<16xf32>
    %151 = vector.shape_cast %150 : vector<16xf32> to vector<16x1xf32>
    %cst_57 = arith.constant 3.200000e+01 : f32
    %152 = vector.broadcast %cst_57 : f32 to vector<16x1xf32>
    %153 = arith.divf %151, %152 : vector<16x1xf32>
    %154 = arith.mulf %149, %149 : vector<16x32xf32>
    %cst_58 = arith.constant dense<0.000000e+00> : vector<16xf32>
    %155 = vector.multi_reduction <add>, %154, %cst_58 [1] : vector<16x32xf32> to vector<16xf32>
    %156 = vector.shape_cast %155 : vector<16xf32> to vector<16x1xf32>
    %cst_59 = arith.constant 3.200000e+01 : f32
    %157 = vector.broadcast %cst_59 : f32 to vector<16x1xf32>
    %158 = arith.divf %156, %157 : vector<16x1xf32>
    %159 = arith.mulf %153, %153 : vector<16x1xf32>
    %160 = arith.subf %158, %159 : vector<16x1xf32>
    %161 = vector.broadcast %153 : vector<16x1xf32> to vector<16x32xf32>
    %162 = arith.subf %149, %161 : vector<16x32xf32>
    %cst_60 = arith.constant 9.99999974E-6 : f32
    %163 = vector.broadcast %cst_60 : f32 to vector<16x1xf32>
    %164 = arith.addf %160, %163 : vector<16x1xf32>
    %165 = math.rsqrt %164 : vector<16x1xf32>
    %166 = vector.broadcast %165 : vector<16x1xf32> to vector<16x32xf32>
    %167 = arith.mulf %162, %166 : vector<16x32xf32>
    %168 = vector.broadcast %3 : vector<1x32xf32> to vector<16x32xf32>
    %169 = arith.mulf %167, %168 : vector<16x32xf32>
    %170 = vector.broadcast %4 : vector<1x32xf32> to vector<16x32xf32>
    %171 = arith.addf %169, %170 : vector<16x32xf32>
    %c1 = arith.constant 1 : index
    %c0_61 = arith.constant 0 : index
    %c0_62 = arith.constant 0 : index
    %172 = vector.load %arg2[%c1, %c0_61, %c0_62] : memref<2x32x96xf32, #tpu.memory_space<vmem>>, vector<1x32x96xf32>
    %173 = vector.shape_cast %172 : vector<1x32x96xf32> to vector<32x96xf32>
    %c1_63 = arith.constant 1 : index
    %c0_64 = arith.constant 0 : index
    %c0_65 = arith.constant 0 : index
    %174 = vector.load %arg3[%c1_63, %c0_64, %c0_65] : memref<2x1x96xf32, #tpu.memory_space<vmem>>, vector<1x1x96xf32>
    %175 = vector.shape_cast %174 : vector<1x1x96xf32> to vector<1x96xf32>
    %c1_66 = arith.constant 1 : index
    %c0_67 = arith.constant 0 : index
    %c0_68 = arith.constant 0 : index
    %176 = vector.load %arg4[%c1_66, %c0_67, %c0_68] : memref<2x32x32xf32, #tpu.memory_space<vmem>>, vector<1x32x32xf32>
    %177 = vector.shape_cast %176 : vector<1x32x32xf32> to vector<32x32xf32>
    %c1_69 = arith.constant 1 : index
    %c0_70 = arith.constant 0 : index
    %c0_71 = arith.constant 0 : index
    %178 = vector.load %arg5[%c1_69, %c0_70, %c0_71] : memref<2x32x64xf32, #tpu.memory_space<vmem>>, vector<1x32x64xf32>
    %179 = vector.shape_cast %178 : vector<1x32x64xf32> to vector<32x64xf32>
    %c1_72 = arith.constant 1 : index
    %c0_73 = arith.constant 0 : index
    %c0_74 = arith.constant 0 : index
    %180 = vector.load %arg6[%c1_72, %c0_73, %c0_74] : memref<2x1x64xf32, #tpu.memory_space<vmem>>, vector<1x1x64xf32>
    %181 = vector.shape_cast %180 : vector<1x1x64xf32> to vector<1x64xf32>
    %c1_75 = arith.constant 1 : index
    %c0_76 = arith.constant 0 : index
    %c0_77 = arith.constant 0 : index
    %182 = vector.load %arg7[%c1_75, %c0_76, %c0_77] : memref<2x64x32xf32, #tpu.memory_space<vmem>>, vector<1x64x32xf32>
    %183 = vector.shape_cast %182 : vector<1x64x32xf32> to vector<64x32xf32>
    %c1_78 = arith.constant 1 : index
    %c0_79 = arith.constant 0 : index
    %c0_80 = arith.constant 0 : index
    %184 = vector.load %arg8[%c1_78, %c0_79, %c0_80] : memref<2x6x32xf32, #tpu.memory_space<vmem>>, vector<1x6x32xf32>
    %185 = vector.shape_cast %184 : vector<1x6x32xf32> to vector<6x32xf32>
    %186 = vector.extract_strided_slice %185 {offsets = [0, 0], sizes = [1, 32], strides = [1, 1]} : vector<6x32xf32> to vector<1x32xf32>
    %187 = vector.extract_strided_slice %185 {offsets = [1, 0], sizes = [1, 32], strides = [1, 1]} : vector<6x32xf32> to vector<1x32xf32>
    %188 = vector.extract_strided_slice %185 {offsets = [2, 0], sizes = [1, 32], strides = [1, 1]} : vector<6x32xf32> to vector<1x32xf32>
    %189 = vector.extract_strided_slice %185 {offsets = [3, 0], sizes = [1, 32], strides = [1, 1]} : vector<6x32xf32> to vector<1x32xf32>
    %190 = vector.extract_strided_slice %185 {offsets = [4, 0], sizes = [1, 32], strides = [1, 1]} : vector<6x32xf32> to vector<1x32xf32>
    %191 = vector.extract_strided_slice %185 {offsets = [5, 0], sizes = [1, 32], strides = [1, 1]} : vector<6x32xf32> to vector<1x32xf32>
    %cst_81 = arith.constant dense<0.000000e+00> : vector<16x96xf32>
    %192 = tpu.matmul %171, %173, %cst_81 {dimension_numbers = #tpu.dot_dimension_numbers<[1], [0], [0], [1], [0, 0, 1, 1], [], []>} : vector<16x32xf32>, vector<32x96xf32>, vector<16x96xf32> -> vector<16x96xf32>
    %193 = vector.broadcast %175 : vector<1x96xf32> to vector<16x96xf32>
    %194 = arith.addf %192, %193 : vector<16x96xf32>
    %195 = vector.extract_strided_slice %194 {offsets = [0, 0], sizes = [16, 8], strides = [1, 1]} : vector<16x96xf32> to vector<16x8xf32>
    %196 = vector.extract_strided_slice %194 {offsets = [0, 32], sizes = [16, 8], strides = [1, 1]} : vector<16x96xf32> to vector<16x8xf32>
    %197 = vector.extract_strided_slice %194 {offsets = [0, 64], sizes = [16, 8], strides = [1, 1]} : vector<16x96xf32> to vector<16x8xf32>
    %cst_82 = arith.constant dense<0.000000e+00> : vector<16x16xf32>
    %198 = tpu.matmul %195, %196, %cst_82 {dimension_numbers = #tpu.dot_dimension_numbers<[1], [1], [0], [0], [0, 0, 1, 0], [], []>} : vector<16x8xf32>, vector<16x8xf32>, vector<16x16xf32> -> vector<16x16xf32>
    %199 = arith.addf %198, %1 : vector<16x16xf32>
    %cst_83 = arith.constant dense<0xFF800000> : vector<16xf32>
    %200 = vector.multi_reduction <maximumf>, %199, %cst_83 [1] : vector<16x16xf32> to vector<16xf32>
    %201 = vector.shape_cast %200 : vector<16xf32> to vector<16x1xf32>
    %202 = vector.broadcast %201 : vector<16x1xf32> to vector<16x16xf32>
    %203 = arith.subf %199, %202 : vector<16x16xf32>
    %204 = math.exp %203 : vector<16x16xf32>
    %cst_84 = arith.constant dense<0.000000e+00> : vector<16xf32>
    %205 = vector.multi_reduction <add>, %204, %cst_84 [1] : vector<16x16xf32> to vector<16xf32>
    %206 = vector.shape_cast %205 : vector<16xf32> to vector<16x1xf32>
    %207 = tpu.reciprocal %206 {approx = true} : vector<16x1xf32> -> vector<16x1xf32>
    %208 = vector.broadcast %207 : vector<16x1xf32> to vector<16x16xf32>
    %209 = arith.mulf %204, %208 : vector<16x16xf32>
    %cst_85 = arith.constant dense<0.000000e+00> : vector<16x8xf32>
    %210 = tpu.matmul %209, %197, %cst_85 {dimension_numbers = #tpu.dot_dimension_numbers<[1], [0], [0], [1], [0, 0, 1, 1], [], []>} : vector<16x16xf32>, vector<16x8xf32>, vector<16x8xf32> -> vector<16x8xf32>
    %211 = vector.extract_strided_slice %194 {offsets = [0, 8], sizes = [16, 8], strides = [1, 1]} : vector<16x96xf32> to vector<16x8xf32>
    %212 = vector.extract_strided_slice %194 {offsets = [0, 40], sizes = [16, 8], strides = [1, 1]} : vector<16x96xf32> to vector<16x8xf32>
    %213 = vector.extract_strided_slice %194 {offsets = [0, 72], sizes = [16, 8], strides = [1, 1]} : vector<16x96xf32> to vector<16x8xf32>
    %cst_86 = arith.constant dense<0.000000e+00> : vector<16x16xf32>
    %214 = tpu.matmul %211, %212, %cst_86 {dimension_numbers = #tpu.dot_dimension_numbers<[1], [1], [0], [0], [0, 0, 1, 0], [], []>} : vector<16x8xf32>, vector<16x8xf32>, vector<16x16xf32> -> vector<16x16xf32>
    %215 = arith.addf %214, %1 : vector<16x16xf32>
    %cst_87 = arith.constant dense<0xFF800000> : vector<16xf32>
    %216 = vector.multi_reduction <maximumf>, %215, %cst_87 [1] : vector<16x16xf32> to vector<16xf32>
    %217 = vector.shape_cast %216 : vector<16xf32> to vector<16x1xf32>
    %218 = vector.broadcast %217 : vector<16x1xf32> to vector<16x16xf32>
    %219 = arith.subf %215, %218 : vector<16x16xf32>
    %220 = math.exp %219 : vector<16x16xf32>
    %cst_88 = arith.constant dense<0.000000e+00> : vector<16xf32>
    %221 = vector.multi_reduction <add>, %220, %cst_88 [1] : vector<16x16xf32> to vector<16xf32>
    %222 = vector.shape_cast %221 : vector<16xf32> to vector<16x1xf32>
    %223 = tpu.reciprocal %222 {approx = true} : vector<16x1xf32> -> vector<16x1xf32>
    %224 = vector.broadcast %223 : vector<16x1xf32> to vector<16x16xf32>
    %225 = arith.mulf %220, %224 : vector<16x16xf32>
    %cst_89 = arith.constant dense<0.000000e+00> : vector<16x8xf32>
    %226 = tpu.matmul %225, %213, %cst_89 {dimension_numbers = #tpu.dot_dimension_numbers<[1], [0], [0], [1], [0, 0, 1, 1], [], []>} : vector<16x16xf32>, vector<16x8xf32>, vector<16x8xf32> -> vector<16x8xf32>
    %227 = vector.extract_strided_slice %194 {offsets = [0, 16], sizes = [16, 8], strides = [1, 1]} : vector<16x96xf32> to vector<16x8xf32>
    %228 = vector.extract_strided_slice %194 {offsets = [0, 48], sizes = [16, 8], strides = [1, 1]} : vector<16x96xf32> to vector<16x8xf32>
    %229 = vector.extract_strided_slice %194 {offsets = [0, 80], sizes = [16, 8], strides = [1, 1]} : vector<16x96xf32> to vector<16x8xf32>
    %cst_90 = arith.constant dense<0.000000e+00> : vector<16x16xf32>
    %230 = tpu.matmul %227, %228, %cst_90 {dimension_numbers = #tpu.dot_dimension_numbers<[1], [1], [0], [0], [0, 0, 1, 0], [], []>} : vector<16x8xf32>, vector<16x8xf32>, vector<16x16xf32> -> vector<16x16xf32>
    %231 = arith.addf %230, %1 : vector<16x16xf32>
    %cst_91 = arith.constant dense<0xFF800000> : vector<16xf32>
    %232 = vector.multi_reduction <maximumf>, %231, %cst_91 [1] : vector<16x16xf32> to vector<16xf32>
    %233 = vector.shape_cast %232 : vector<16xf32> to vector<16x1xf32>
    %234 = vector.broadcast %233 : vector<16x1xf32> to vector<16x16xf32>
    %235 = arith.subf %231, %234 : vector<16x16xf32>
    %236 = math.exp %235 : vector<16x16xf32>
    %cst_92 = arith.constant dense<0.000000e+00> : vector<16xf32>
    %237 = vector.multi_reduction <add>, %236, %cst_92 [1] : vector<16x16xf32> to vector<16xf32>
    %238 = vector.shape_cast %237 : vector<16xf32> to vector<16x1xf32>
    %239 = tpu.reciprocal %238 {approx = true} : vector<16x1xf32> -> vector<16x1xf32>
    %240 = vector.broadcast %239 : vector<16x1xf32> to vector<16x16xf32>
    %241 = arith.mulf %236, %240 : vector<16x16xf32>
    %cst_93 = arith.constant dense<0.000000e+00> : vector<16x8xf32>
    %242 = tpu.matmul %241, %229, %cst_93 {dimension_numbers = #tpu.dot_dimension_numbers<[1], [0], [0], [1], [0, 0, 1, 1], [], []>} : vector<16x16xf32>, vector<16x8xf32>, vector<16x8xf32> -> vector<16x8xf32>
    %243 = vector.extract_strided_slice %194 {offsets = [0, 24], sizes = [16, 8], strides = [1, 1]} : vector<16x96xf32> to vector<16x8xf32>
    %244 = vector.extract_strided_slice %194 {offsets = [0, 56], sizes = [16, 8], strides = [1, 1]} : vector<16x96xf32> to vector<16x8xf32>
    %245 = vector.extract_strided_slice %194 {offsets = [0, 88], sizes = [16, 8], strides = [1, 1]} : vector<16x96xf32> to vector<16x8xf32>
    %cst_94 = arith.constant dense<0.000000e+00> : vector<16x16xf32>
    %246 = tpu.matmul %243, %244, %cst_94 {dimension_numbers = #tpu.dot_dimension_numbers<[1], [1], [0], [0], [0, 0, 1, 0], [], []>} : vector<16x8xf32>, vector<16x8xf32>, vector<16x16xf32> -> vector<16x16xf32>
    %247 = arith.addf %246, %1 : vector<16x16xf32>
    %cst_95 = arith.constant dense<0xFF800000> : vector<16xf32>
    %248 = vector.multi_reduction <maximumf>, %247, %cst_95 [1] : vector<16x16xf32> to vector<16xf32>
    %249 = vector.shape_cast %248 : vector<16xf32> to vector<16x1xf32>
    %250 = vector.broadcast %249 : vector<16x1xf32> to vector<16x16xf32>
    %251 = arith.subf %247, %250 : vector<16x16xf32>
    %252 = math.exp %251 : vector<16x16xf32>
    %cst_96 = arith.constant dense<0.000000e+00> : vector<16xf32>
    %253 = vector.multi_reduction <add>, %252, %cst_96 [1] : vector<16x16xf32> to vector<16xf32>
    %254 = vector.shape_cast %253 : vector<16xf32> to vector<16x1xf32>
    %255 = tpu.reciprocal %254 {approx = true} : vector<16x1xf32> -> vector<16x1xf32>
    %256 = vector.broadcast %255 : vector<16x1xf32> to vector<16x16xf32>
    %257 = arith.mulf %252, %256 : vector<16x16xf32>
    %cst_97 = arith.constant dense<0.000000e+00> : vector<16x8xf32>
    %258 = tpu.matmul %257, %245, %cst_97 {dimension_numbers = #tpu.dot_dimension_numbers<[1], [0], [0], [1], [0, 0, 1, 1], [], []>} : vector<16x16xf32>, vector<16x8xf32>, vector<16x8xf32> -> vector<16x8xf32>
    %259 = tpu.concatenate %210, %226, %242, %258 in 1 : vector<16x8xf32>, vector<16x8xf32>, vector<16x8xf32>, vector<16x8xf32> -> vector<16x32xf32>
    %cst_98 = arith.constant dense<0.000000e+00> : vector<16x32xf32>
    %260 = tpu.matmul %259, %177, %cst_98 {dimension_numbers = #tpu.dot_dimension_numbers<[1], [0], [0], [1], [0, 0, 1, 1], [], []>} : vector<16x32xf32>, vector<32x32xf32>, vector<16x32xf32> -> vector<16x32xf32>
    %261 = vector.broadcast %186 : vector<1x32xf32> to vector<16x32xf32>
    %262 = arith.addf %260, %261 : vector<16x32xf32>
    %263 = arith.addf %171, %262 : vector<16x32xf32>
    %cst_99 = arith.constant dense<0.000000e+00> : vector<16xf32>
    %264 = vector.multi_reduction <add>, %263, %cst_99 [1] : vector<16x32xf32> to vector<16xf32>
    %265 = vector.shape_cast %264 : vector<16xf32> to vector<16x1xf32>
    %cst_100 = arith.constant 3.200000e+01 : f32
    %266 = vector.broadcast %cst_100 : f32 to vector<16x1xf32>
    %267 = arith.divf %265, %266 : vector<16x1xf32>
    %268 = arith.mulf %263, %263 : vector<16x32xf32>
    %cst_101 = arith.constant dense<0.000000e+00> : vector<16xf32>
    %269 = vector.multi_reduction <add>, %268, %cst_101 [1] : vector<16x32xf32> to vector<16xf32>
    %270 = vector.shape_cast %269 : vector<16xf32> to vector<16x1xf32>
    %cst_102 = arith.constant 3.200000e+01 : f32
    %271 = vector.broadcast %cst_102 : f32 to vector<16x1xf32>
    %272 = arith.divf %270, %271 : vector<16x1xf32>
    %273 = arith.mulf %267, %267 : vector<16x1xf32>
    %274 = arith.subf %272, %273 : vector<16x1xf32>
    %275 = vector.broadcast %267 : vector<16x1xf32> to vector<16x32xf32>
    %276 = arith.subf %263, %275 : vector<16x32xf32>
    %cst_103 = arith.constant 9.99999974E-6 : f32
    %277 = vector.broadcast %cst_103 : f32 to vector<16x1xf32>
    %278 = arith.addf %274, %277 : vector<16x1xf32>
    %279 = math.rsqrt %278 : vector<16x1xf32>
    %280 = vector.broadcast %279 : vector<16x1xf32> to vector<16x32xf32>
    %281 = arith.mulf %276, %280 : vector<16x32xf32>
    %282 = vector.broadcast %188 : vector<1x32xf32> to vector<16x32xf32>
    %283 = arith.mulf %281, %282 : vector<16x32xf32>
    %284 = vector.broadcast %189 : vector<1x32xf32> to vector<16x32xf32>
    %285 = arith.addf %283, %284 : vector<16x32xf32>
    %cst_104 = arith.constant dense<0.000000e+00> : vector<16x64xf32>
    %286 = tpu.matmul %285, %179, %cst_104 {dimension_numbers = #tpu.dot_dimension_numbers<[1], [0], [0], [1], [0, 0, 1, 1], [], []>} : vector<16x32xf32>, vector<32x64xf32>, vector<16x64xf32> -> vector<16x64xf32>
    %287 = vector.broadcast %181 : vector<1x64xf32> to vector<16x64xf32>
    %288 = arith.addf %286, %287 : vector<16x64xf32>
    %cst_105 = arith.constant 0.000000e+00 : f32
    %289 = vector.broadcast %cst_105 : f32 to vector<16x64xf32>
    %290 = arith.maximumf %288, %289 : vector<16x64xf32>
    %cst_106 = arith.constant dense<0.000000e+00> : vector<16x32xf32>
    %291 = tpu.matmul %290, %183, %cst_106 {dimension_numbers = #tpu.dot_dimension_numbers<[1], [0], [0], [1], [0, 0, 1, 1], [], []>} : vector<16x64xf32>, vector<64x32xf32>, vector<16x32xf32> -> vector<16x32xf32>
    %292 = vector.broadcast %187 : vector<1x32xf32> to vector<16x32xf32>
    %293 = arith.addf %291, %292 : vector<16x32xf32>
    %294 = arith.addf %285, %293 : vector<16x32xf32>
    %cst_107 = arith.constant dense<0.000000e+00> : vector<16xf32>
    %295 = vector.multi_reduction <add>, %294, %cst_107 [1] : vector<16x32xf32> to vector<16xf32>
    %296 = vector.shape_cast %295 : vector<16xf32> to vector<16x1xf32>
    %cst_108 = arith.constant 3.200000e+01 : f32
    %297 = vector.broadcast %cst_108 : f32 to vector<16x1xf32>
    %298 = arith.divf %296, %297 : vector<16x1xf32>
    %299 = arith.mulf %294, %294 : vector<16x32xf32>
    %cst_109 = arith.constant dense<0.000000e+00> : vector<16xf32>
    %300 = vector.multi_reduction <add>, %299, %cst_109 [1] : vector<16x32xf32> to vector<16xf32>
    %301 = vector.shape_cast %300 : vector<16xf32> to vector<16x1xf32>
    %cst_110 = arith.constant 3.200000e+01 : f32
    %302 = vector.broadcast %cst_110 : f32 to vector<16x1xf32>
    %303 = arith.divf %301, %302 : vector<16x1xf32>
    %304 = arith.mulf %298, %298 : vector<16x1xf32>
    %305 = arith.subf %303, %304 : vector<16x1xf32>
    %306 = vector.broadcast %298 : vector<16x1xf32> to vector<16x32xf32>
    %307 = arith.subf %294, %306 : vector<16x32xf32>
    %cst_111 = arith.constant 9.99999974E-6 : f32
    %308 = vector.broadcast %cst_111 : f32 to vector<16x1xf32>
    %309 = arith.addf %305, %308 : vector<16x1xf32>
    %310 = math.rsqrt %309 : vector<16x1xf32>
    %311 = vector.broadcast %310 : vector<16x1xf32> to vector<16x32xf32>
    %312 = arith.mulf %307, %311 : vector<16x32xf32>
    %313 = vector.broadcast %190 : vector<1x32xf32> to vector<16x32xf32>
    %314 = arith.mulf %312, %313 : vector<16x32xf32>
    %315 = vector.broadcast %191 : vector<1x32xf32> to vector<16x32xf32>
    %316 = arith.addf %314, %315 : vector<16x32xf32>
    %cst_112 = arith.constant dense<0.000000e+00> : vector<16xf32>
    %317 = vector.multi_reduction <add>, %316, %cst_112 [1] : vector<16x32xf32> to vector<16xf32>
    %318 = vector.shape_cast %317 : vector<16xf32> to vector<16x1xf32>
    %cst_113 = arith.constant 3.200000e+01 : f32
    %319 = vector.broadcast %cst_113 : f32 to vector<16x1xf32>
    %320 = arith.divf %318, %319 : vector<16x1xf32>
    %321 = arith.mulf %316, %316 : vector<16x32xf32>
    %cst_114 = arith.constant dense<0.000000e+00> : vector<16xf32>
    %322 = vector.multi_reduction <add>, %321, %cst_114 [1] : vector<16x32xf32> to vector<16xf32>
    %323 = vector.shape_cast %322 : vector<16xf32> to vector<16x1xf32>
    %cst_115 = arith.constant 3.200000e+01 : f32
    %324 = vector.broadcast %cst_115 : f32 to vector<16x1xf32>
    %325 = arith.divf %323, %324 : vector<16x1xf32>
    %326 = arith.mulf %320, %320 : vector<16x1xf32>
    %327 = arith.subf %325, %326 : vector<16x1xf32>
    %328 = vector.broadcast %320 : vector<16x1xf32> to vector<16x32xf32>
    %329 = arith.subf %316, %328 : vector<16x32xf32>
    %cst_116 = arith.constant 9.99999974E-6 : f32
    %330 = vector.broadcast %cst_116 : f32 to vector<16x1xf32>
    %331 = arith.addf %327, %330 : vector<16x1xf32>
    %332 = math.rsqrt %331 : vector<16x1xf32>
    %333 = vector.broadcast %332 : vector<16x1xf32> to vector<16x32xf32>
    %334 = arith.mulf %329, %333 : vector<16x32xf32>
    %335 = vector.broadcast %3 : vector<1x32xf32> to vector<16x32xf32>
    %336 = arith.mulf %334, %335 : vector<16x32xf32>
    %337 = vector.broadcast %4 : vector<1x32xf32> to vector<16x32xf32>
    %338 = arith.addf %336, %337 : vector<16x32xf32>
    %c0_117 = arith.constant 0 : index
    %c0_118 = arith.constant 0 : index
    %339 = vector.load %arg10[%c0_117, %c0_118] : memref<16x32xf32, #tpu.memory_space<vmem>>, vector<16x32xf32>
    tpu.vector_store %arg10[%c0_117, %c0_118], %338 {strides = array<i32>} : memref<16x32xf32, #tpu.memory_space<vmem>>, vector<16x32xf32>,
    return
  }
}

</mosaic_0001>

<bundles_post_ra>
// kernel: tpu_custom_call.1
= control target key start
LH: loop header
LB: loop body
LE: loop exit
PB: predicated region body
PF: predicated region fallthrough
CT: control target
= control target key end

     0   :  { %15 = vsyncpa [#allocation3], 0  ;;  %s4172_s0 = inlined_call_operand.vmem [shape: f32[16,32], index: 0, kind: input, shape index: {}]   ;;  %s4173_s1 = inlined_call_operand.hbm [shape: f32[16,16], index: 1, kind: input, shape index: {}]   ;;  %s4174_s2 = inlined_call_operand.vmem [shape: f32[2,32,96], index: 2, kind: input, shape index: {}]   ;;  %s4175_s3 = inlined_call_operand.vmem [shape: f32[2,1,96], index: 3, kind: input, shape index: {}]   ;;  %s4176_s4 = inlined_call_operand.vmem [shape: f32[2,32,32], index: 4, kind: input, shape index: {}]   ;;  %s4177_s5 = inlined_call_operand.vmem [shape: f32[2,32,64], index: 5, kind: input, shape index: {}]   ;;  %s4178_s6 = inlined_call_operand.vmem [shape: f32[2,1,64], index: 6, kind: input, shape index: {}]   ;;  %s4179_s7 = inlined_call_operand.vmem [shape: f32[2,64,32], index: 7, kind: input, shape index: {}]   ;;  %s4180_s8 = inlined_call_operand.vmem [shape: f32[2,6,32], index: 8, kind: input, shape index: {}]   ;;  %s4181_s9 = inlined_call_operand.vmem [shape: f32[2,32], index: 9, kind: input, shape index: {}]   ;;  %s4182_s10 = inlined_call_operand.hbm [shape: f32[16,32], index: 10, kind: output, shape index: {}]  }
   0x1   :  { %16 = vsyncpa [#allocation4], 0  ;;  %s3555_s13 = smov [#allocation2]   ;;  %s3507_s17 = scalar_lea.hbm %s4173_s1, 256 }
   0x2   :  { %s24_s14 = sshll.u32 %s3555_s13, 4  ;;  %p3508_p0 = scmp.ne.s32.totalorder %s4173_s1, %s3507_s17  ;;  %s25_s14 = int_to_ptr.vmem [resolvable:$true] %s24_s14 }
   0x3   :  { %p3511_p1 = scmp.lt.u32.totalorder %s3507_s17, %s4173_s1 }
   0x5   :  { %p3513_p2 = pnand %p3511_p1, %p3508_p0 }
   0x7   :  { %3516 = shalt.err (!%p3513_p2)
}
   0x8   :  { %s3517_s22 = scalar_lea.vmem %s25_s14, 256  ;;  %p3522_p4 = scmp.lt.s32.totalorder %s25_s14, %s25_s14 }
   0x9   :  { %p3518_p3 = scmp.ne.s32.totalorder %s25_s14, %s3517_s22  ;;  %p3523_p5 = scmp.lt.s32.totalorder %s3517_s22, %s3517_s22 }
   0xb   :  { %p3524_p6 = por %p3523_p5, %p3522_p4 }
   0xd   :  { %p3525_p7 = pnand %p3524_p6, %p3518_p3 }
   0xf   :  { %3528 = shalt.err (!%p3525_p7)
}
  0x10   :  { %s4183_s23 = smov 128   ;;  %s3557_s24 = smov 8  }
  0x11   :  { %30 = dma.hbm_to_vmem [thread:$0]  %s4173_s1, 256, %s25_s14, [#allocation3], %s4183_s23, %s4183_s23, %s3557_s24  }
  0x12   :  { %3551 = dma.done.wait [#allocation3], 256  }
  0x13   :  { %3552 = vsyncadd [#allocation3], 4294967040  ;;  %vm84_vm0 = vcmask 261120   ;;  %v55_v0 = vld [vmem:[%s4174_s2] sm:$0xff]  ;;  %v56_v1 = vld [vmem:[%s4174_s2 + $0x8] sm:$0xff]  ;;  %vm172_vm1 = vcmask 64512  }
  0x14   :  { %v57_v2 = vld [vmem:[%s4174_s2 + $0x10] sm:$0xff]  ;;  %v3160_v3 = vpack.c.bf16 %v56_v1, %v55_v0  ;;  %v58_v4 = vld [vmem:[%s4174_s2 + $0x18] sm:$0xff]  ;;  %v3657_v5 = vld [vmem:[%s4172_s0] sm:$0xff]  ;;  %s3558_s20 = smov 120   ;;  %s3560_s21 = smov 88   ;;  %vm256_vm3 = vcmask 130048  }
  0x15   :  { %v3164_v6 = vpack.c.bf16 %v58_v4, %v57_v2  ;;  %2952 = vmatprep.mubr.msk.f32.mxu1 %vm84_vm0, %v3657_v5  ;;  %v3664_v7 = vld [vmem:[%s4172_s0 + $0x8] sm:$0xff]  ;;  %v2733_v8 = vld [vmem:[%s4175_s3] ss:$0 sm:$0xff]  ;;  %s3559_s0 = smov 96   ;;  %vm3691_vm2 = vmpackc.low %vm172_vm1, %vm172_vm1  ;;  %s3561_s22 = smov 64   ;;  %vm994_vm4 = vcmask 195584  }
  0x16   :  { %3161 = vmatprep.subr.bf16.mxu1 %v3160_v3  ;;  %v3707_v25 = vld [vmem:[#allocation2 + $0x8] sm:$0xff]  ;;  %v3709_v26 = vld [vmem:[#allocation2] sm:$0xff]  ;;  %s3562_s25 = smov 80   ;;  %s3563_s26 = smov 56   ;;  %vm1220_vm5 = vcmask 523264  }
  0x17   :  { %3163 = vmatpush3.bf16.msra.mxu1 %v3160_v3  ;;  %s3564_s27 = smov 112   ;;  %s3565_s28 = smov 72  }
  0x18   :  { %3165 = vmatprep.subr.bf16.mxu1 %v3164_v6  ;;  %s3566_s29 = smov 104   ;;  %s3567_s30 = smov 48  }
  0x19   :  { %s3568_s11 = smov 40   ;;  %s4186_s12 = smov 16  }
  0x1a   :  { %s4184_s13 = smov 24  }
  0x1b   :  { %3167 = vmatpush3.bf16.msra.mxu1 %v3164_v6 }
  0x1e   :  { %2953 = vmatmul.mubr.msk.f32.vlgmr.msra.gmra.mrb[0].mxu1 %vm84_vm0, %v3664_v7 }
  0xf1   :  { %v2954_v9 = vpop.f32.mrb[0].mxu1 }
  0xf2   :  { %v3671_v10 = vadd.f32 %v2954_v9, %v2733_v8  ;;  %v157_v11 = vpop.f32.mrb[1].mxu1 }
  0xf3   :  { %v3673_v12 = vadd.f32 %v2733_v8, %v157_v11 }
  0xf5   :  { %366 = vrot.lane.b32.xlu1 %v3673_v12, %s3558_s20  ;;  %2959 = vmatprep.mubr.msk.f32.mxu1 %vm172_vm1, %v3673_v12  ;;  %v3681_v13 = vpack.i.bf16 %v3671_v10, %v3673_v12 }
  0xf7   :  { %3338 = vrot.lane.b32.xlu0 %v3681_v13, %s3559_s0 }
  0xf9   :  { %368 = vrot.lane.b32.xlu1 %v3671_v10, %s3558_s20 }
  0xfb   :  { %3343 = vrot.lane.b32.xlu0 %v3681_v13, %s3560_s21 }
 0x167   :  { %v367_v23 = vpop.permute.xlu1 %366 }
 0x169   :  { %v3339_v14 = vpop.permute.xlu0 %3338 }
 0x16a   :  { %v3341_v15 = vunpack.i.h.bf16 %v3339_v14  ;;  %v3340_v16 = vunpack.i.l.bf16 %v3339_v14 }
 0x16b   :  { %v369_v24 = vpop.permute.xlu1 %368 }
 0x16c   :  { %v3168_v18 = vpack.c.bf16 %v3341_v15, %v3340_v16 }
 0x16d   :  { %v3344_v19 = vpop.permute.xlu0 %3343 }
 0x16e   :  { %v3346_v20 = vunpack.i.h.bf16 %v3344_v19  ;;  %v3345_v21 = vunpack.i.l.bf16 %v3344_v19  ;;  %3170 = vmatprep.subr.msk.bf16.mxu1 %vm3691_vm2, %v3168_v18 }
 0x16f   :  { %3173 = vmatpush3.bf16.xpose.msk.msra.mxu1 %vm3691_vm2, %v3168_v18 }
 0x170   :  { %v3178_v22 = vpack.c.bf16 %v3346_v20, %v3345_v21 }
 0x172   :  { %3180 = vmatprep.subr.msk.bf16.mxu1 %vm3691_vm2, %v3178_v22 }
 0x176   :  { %2960 = vmatmul.mubr.msk.f32.vlgmr.msra.gmra.mrb[2].mxu1 %vm172_vm1, %v3671_v10 }
 0x177   :  { %3183 = vmatpush3.bf16.xpose.msk.msra.mxu1 %vm3691_vm2, %v3178_v22  ;;  %2973 = vmatprep.mubr.msk.f32.mxu1 %vm172_vm1, %v367_v23 }
 0x17e   :  { %2974 = vmatmul.mubr.msk.f32.vlgmr.msra.gmra.mrb[4].mxu1 %vm172_vm1, %v369_v24 }
 0x249   :  { %v2961_v27 = vpop.f32.mrb[2].mxu1 }
 0x24a   :  { %v253_v28 = vadd.f32 %v2961_v27, %v3707_v25  ;;  %v247_v29 = vpop.f32.mrb[3].mxu1 }
 0x24b   :  { %v248_v30 = vadd.f32 %v247_v29, %v3709_v26 }
 0x24c   :  { %v260_v31 = vsel %vm256_vm3, %v253_v28, -inf }
 0x24d   :  { %261 = vmax.xlane.f32.xlu1 %v260_v31  ;;  %v257_v32 = vsel %vm256_vm3, %v248_v30, -inf }
 0x24e   :  { %258 = vmax.xlane.f32.xlu0 %v257_v32 }
 0x251   :  { %v2975_v33 = vpop.f32.mrb[4].mxu1 }
 0x252   :  { %v448_v34 = vpop.f32.mrb[5].mxu1  ;;  %v454_v36 = vadd.f32 %v2975_v33, %v3707_v25 }
 0x253   :  { %v449_v35 = vadd.f32 %v448_v34, %v3709_v26 }
 0x254   :  { %v460_v38 = vsel %vm256_vm3, %v454_v36, -inf }
 0x255   :  { %v457_v37 = vsel %vm256_vm3, %v449_v35, -inf }
 0x256   :  { %458 = vmax.xlane.f32.xlu0 %v457_v37 }
 0x25a   :  { %461 = vmax.xlane.f32.xlu0 %v460_v38 }
 0x25e   :  { %3348 = vrot.lane.b32.xlu1 %v3681_v13, %s3561_s22 }
 0x2da   :  { %v262_v39 = vpop.xlane.xlu1 %261 }
 0x2db   :  { %v264_v40 = vsub.f32 %v253_v28, %v262_v39  ;;  %v259_v41 = vpop.xlane.xlu0 %258 }
 0x2dc   :  { %v263_v42 = vsub.f32 %v248_v30, %v259_v41 }
 0x2dd   :  { %v267_v43 = vmul.f32 1.442695, %v264_v40 }
 0x2de   :  { %v265_v44 = vmul.f32 1.442695, %v263_v42  ;;  %v3349_v45 = vpop.permute.xlu1 %3348 }
 0x2df   :  { %3417 = vpow2.f32 %v267_v43  ;;  %v3351_v46 = vunpack.i.h.bf16 %v3349_v45  ;;  %v3350_v47 = vunpack.i.l.bf16 %v3349_v45 }
 0x2e0   :  { %3419 = vpow2.f32 %v265_v44 }
 0x2e1   :  { %v3174_v48 = vpack.c.bf16 %v3351_v46, %v3350_v47 }
 0x2e3   :  { %3175 = vmatprep.subr.bf16.mxu0 %v3174_v48  ;;  %v459_v49 = vpop.xlane.xlu0 %458 }
 0x2e4   :  { %3177 = vmatpush3.bf16.msra.mxu0 %v3174_v48  ;;  %v463_v59 = vsub.f32 %v449_v35, %v459_v49 }
 0x2e6   :  { %v465_v60 = vmul.f32 1.442695, %v463_v59 }
 0x2e7   :  { %v462_v50 = vpop.xlane.xlu0 %461 }
 0x2e8   :  { %v464_v51 = vsub.f32 %v454_v36, %v462_v50 }
 0x2e9   :  { %v3418_v52 = vpop.eup %3417 }
 0x2ea   :  { %v3420_v53 = vpop.eup %3419  ;;  %v467_v54 = vmul.f32 1.442695, %v464_v51  ;;  %v272_v55 = vsel %vm256_vm3, %v3418_v52, 0.0 }
 0x2eb   :  { %273 = vadd.xlane.f32.xlu0 %v272_v55  ;;  %v269_v56 = vsel %vm256_vm3, %v3420_v53, 0.0 }
 0x2ec   :  { %3421 = vpow2.f32 %v467_v54  ;;  %270 = vadd.xlane.f32.xlu1 %v269_v56 }
 0x2ed   :  { %3423 = vpow2.f32 %v465_v60 }
 0x2f6   :  { %v3422_v57 = vpop.eup %3421 }
 0x2f7   :  { %v472_v58 = vsel %vm256_vm3, %v3422_v57, 0.0  ;;  %v3424_v61 = vpop.eup %3423 }
 0x2f8   :  { %473 = vadd.xlane.f32.xlu0 %v472_v58  ;;  %v469_v62 = vsel %vm256_vm3, %v3424_v61, 0.0 }
 0x2fd   :  { %3358 = vrot.lane.b32.xlu1 %v3681_v13, %s3562_s25 }
 0x30e   :  { %3353 = vrot.lane.b32.xlu0 %v3681_v13, %s3563_s26 }
 0x312   :  { %568 = vrot.lane.b32.xlu0 %v3671_v10, %s3564_s27 }
 0x321   :  { %470 = vadd.xlane.f32.xlu1 %v469_v62 }
 0x332   :  { %566 = vrot.lane.b32.xlu1 %v3673_v12, %s3564_s27 }
 0x378   :  { %v274_v63 = vpop.xlane.xlu0 %273 }
 0x379   :  { %3425 = vrcp.f32 %v274_v63  ;;  %v271_v0 = vpop.xlane.xlu1 %270 }
 0x37a   :  { %3427 = vrcp.f32 %v271_v0 }
 0x37d   :  { %v3359_v8 = vpop.permute.xlu1 %3358 }
 0x37e   :  { %v3361_v11 = vunpack.i.h.bf16 %v3359_v8  ;;  %v3360_v14 = vunpack.i.l.bf16 %v3359_v8 }
 0x380   :  { %v3188_v19 = vpack.c.bf16 %v3361_v11, %v3360_v14 }
 0x383   :  { %v3426_v1 = vpop.eup %3425 }
 0x384   :  { %v3428_v2 = vpop.eup %3427  ;;  %v278_v6 = vmul.f32 %v3426_v1, %v3418_v52 }
 0x385   :  { %v474_v3 = vpop.xlane.xlu0 %473  ;;  %v277_v4 = vmul.f32 %v3428_v2, %v3420_v53 }
 0x386   :  { %3429 = vrcp.f32 %v474_v3 }
 0x387   :  { %2966 = vmatprep.mubr.msk.f32.mxu0 %vm256_vm3, %v277_v4 }
 0x388   :  { %2967 = vmatmul.mubr.msk.f32.vlgmr.msra.gmra.mrb[0].mxu0 %vm256_vm3, %v278_v6 }
 0x389   :  { %v3354_v9 = vpop.permute.xlu0 %3353 }
 0x38a   :  { %v3356_v15 = vunpack.i.h.bf16 %v3354_v9  ;;  %v3355_v16 = vunpack.i.l.bf16 %v3354_v9 }
 0x38c   :  { %v3184_v18 = vpack.c.bf16 %v3356_v15, %v3355_v16 }
 0x38d   :  { %v569_v28 = vpop.permute.xlu0 %568 }
 0x38e   :  { %3185 = vmatprep.subr.bf16.mxu0 %v3184_v18 }
 0x38f   :  { %3187 = vmatpush3.bf16.msra.mxu0 %v3184_v18 }
 0x390   :  { %3190 = vmatprep.subr.msk.bf16.mxu0 %vm3691_vm2, %v3188_v19  ;;  %v3430_v21 = vpop.eup %3429 }
 0x391   :  { %v478_v24 = vmul.f32 %v3430_v21, %v3422_v57 }
 0x3ae   :  { %v471_v20 = vpop.xlane.xlu1 %470 }
 0x3af   :  { %3431 = vrcp.f32 %v471_v20 }
 0x3b2   :  { %v567_v27 = vpop.permute.xlu1 %566 }
 0x3b9   :  { %v3432_v22 = vpop.eup %3431 }
 0x3ba   :  { %v477_v23 = vmul.f32 %v3432_v22, %v3424_v61 }
 0x3bc   :  { %2980 = vmatprep.mubr.msk.f32.mxu0 %vm256_vm3, %v477_v23 }
 0x3bd   :  { %2981 = vmatmul.mubr.msk.f32.vlgmr.msra.gmra.mrb[2].mxu0 %vm256_vm3, %v478_v24 }
 0x3be   :  { %3193 = vmatpush3.bf16.xpose.msk.msra.mxu0 %vm3691_vm2, %v3188_v19  ;;  %2987 = vmatprep.mubr.msk.f32.mxu0 %vm172_vm1, %v567_v27 }
 0x3c5   :  { %2988 = vmatmul.mubr.msk.f32.vlgmr.msra.gmra.mrb[4].mxu0 %vm172_vm1, %v569_v28 }
 0x45b   :  { %v3743_v29 = vpop.f32.mrb[0].mxu0 }
 0x45c   :  { %v3745_v30 = vpop.f32.mrb[1].mxu0 }
 0x490   :  { %v3747_v31 = vpop.f32.mrb[2].mxu0 }
 0x491   :  { %v3749_v32 = vpop.f32.mrb[3].mxu0 }
 0x498   :  { %v2989_v33 = vpop.f32.mrb[4].mxu0 }
 0x499   :  { %v654_v34 = vadd.f32 %v2989_v33, %v3707_v25  ;;  %v648_v35 = vpop.f32.mrb[5].mxu0 }
 0x49a   :  { %v649_v36 = vadd.f32 %v648_v35, %v3709_v26 }
 0x49b   :  { %v660_v37 = vsel %vm256_vm3, %v654_v34, -inf }
 0x49c   :  { %661 = vmax.xlane.f32.xlu0 %v660_v37  ;;  %v657_v38 = vsel %vm256_vm3, %v649_v36, -inf  ;;  %v61_v37 = vld [vmem:[%s4176_s4 + $0x8] sm:$0xff] }
 0x49d   :  { %658 = vmax.xlane.f32.xlu1 %v657_v38  ;;  %v62_v38 = vld [vmem:[%s4176_s4 + $0x10] sm:$0xff] }
 0x529   :  { %v662_v39 = vpop.xlane.xlu0 %661 }
 0x52a   :  { %v664_v40 = vsub.f32 %v654_v34, %v662_v39  ;;  %v659_v41 = vpop.xlane.xlu1 %658 }
 0x52b   :  { %v663_v42 = vsub.f32 %v649_v36, %v659_v41 }
 0x52c   :  { %v667_v43 = vmul.f32 1.442695, %v664_v40  ;;  %v63_v40 = vld [vmem:[%s4176_s4 + $0x18] sm:$0xff] }
 0x52d   :  { %v665_v44 = vmul.f32 1.442695, %v663_v42  ;;  %v3212_v41 = vpack.c.bf16 %v63_v40, %v62_v38 }
 0x52e   :  { %3433 = vpow2.f32 %v667_v43 }
 0x52f   :  { %3435 = vpow2.f32 %v665_v44 }
 0x538   :  { %v3434_v45 = vpop.eup %3433 }
 0x539   :  { %v3436_v46 = vpop.eup %3435  ;;  %v672_v47 = vsel %vm256_vm3, %v3434_v45, 0.0 }
 0x53a   :  { %673 = vadd.xlane.f32.xlu1 %v672_v47  ;;  %v669_v48 = vsel %vm256_vm3, %v3436_v46, 0.0 }
 0x53b   :  { %670 = vadd.xlane.f32.xlu0 %v669_v48 }
 0x54b   :  { %3368 = vrot.lane.b32.xlu1 %v3681_v13, %s3565_s28 }
 0x54f   :  { %766 = vrot.lane.b32.xlu1 %v3673_v12, %s3566_s29 }
 0x551   :  { %3363 = vrot.lane.b32.xlu0 %v3681_v13, %s3567_s30 }
 0x555   :  { %768 = vrot.lane.b32.xlu0 %v3671_v10, %s3566_s29 }
 0x5c7   :  { %v674_v49 = vpop.xlane.xlu1 %673 }
 0x5c8   :  { %3437 = vrcp.f32 %v674_v49  ;;  %v671_v50 = vpop.xlane.xlu0 %670 }
 0x5c9   :  { %3439 = vrcp.f32 %v671_v50 }
 0x5cb   :  { %v3369_v51 = vpop.permute.xlu1 %3368 }
 0x5cc   :  { %v3364_v52 = vpop.permute.xlu0 %3363  ;;  %v3371_v53 = vunpack.i.h.bf16 %v3369_v51  ;;  %v3370_v54 = vunpack.i.l.bf16 %v3369_v51 }
 0x5cd   :  { %v3366_v55 = vunpack.i.h.bf16 %v3364_v52  ;;  %v3365_v56 = vunpack.i.l.bf16 %v3364_v52 }
 0x5ce   :  { %v3198_v58 = vpack.c.bf16 %v3371_v53, %v3370_v54 }
 0x5cf   :  { %v3194_v57 = vpack.c.bf16 %v3366_v55, %v3365_v56  ;;  %v767_v61 = vpop.permute.xlu1 %766  ;;  %v997_v56 = vlaneseq }
 0x5d0   :  { %v769_v62 = vpop.permute.xlu0 %768 }
 0x5d1   :  { %3195 = vmatprep.subr.bf16.mxu1 %v3194_v57 }
 0x5d2   :  { %v3438_v12 = vpop.eup %3437  ;;  %3197 = vmatpush3.bf16.msra.mxu1 %v3194_v57  ;;  %v3813_v57 = vshrl.u32 %v997_v56, 7  ;;  %v76_v56 = vld [vmem:[%s4179_s7 + $0x38] sm:$0xff] }
 0x5d3   :  { %v3440_v59 = vpop.eup %3439  ;;  %3200 = vmatprep.subr.msk.bf16.mxu1 %vm3691_vm2, %v3198_v58  ;;  %v678_v60 = vmul.f32 %v3438_v12, %v3434_v45 }
 0x5d4   :  { %v677_v10 = vmul.f32 %v3440_v59, %v3436_v46 }
 0x5d6   :  { %2994 = vmatprep.mubr.msk.f32.mxu1 %vm256_vm3, %v677_v10 }
 0x5d7   :  { %2995 = vmatmul.mubr.msk.f32.vlgmr.msra.gmra.mrb[6].mxu1 %vm256_vm3, %v678_v60 }
 0x5d8   :  { %3001 = vmatprep.mubr.msk.f32.mxu1 %vm172_vm1, %v767_v61 }
 0x5db   :  { %3203 = vmatpush3.bf16.xpose.msk.msra.mxu1 %vm3691_vm2, %v3198_v58 }
 0x5e2   :  { %3002 = vmatmul.mubr.msk.f32.vlgmr.msra.gmra.mrb[8].mxu1 %vm172_vm1, %v769_v62 }
 0x6aa   :  { %v2996_v63 = vpop.f32.mrb[6].mxu1 }
 0x6ab   :  { %v757_v0 = vpop.f32.mrb[7].mxu1 }
 0x6b5   :  { %v3003_v1 = vpop.f32.mrb[8].mxu1 }
 0x6b6   :  { %v854_v2 = vadd.f32 %v3003_v1, %v3707_v25  ;;  %v848_v3 = vpop.f32.mrb[9].mxu1 }
 0x6b7   :  { %v849_v4 = vadd.f32 %v848_v3, %v3709_v26 }
 0x6b8   :  { %v860_v6 = vsel %vm256_vm3, %v854_v2, -inf }
 0x6b9   :  { %861 = vmax.xlane.f32.xlu0 %v860_v6  ;;  %v857_v8 = vsel %vm256_vm3, %v849_v4, -inf }
 0x6ba   :  { %858 = vmax.xlane.f32.xlu1 %v857_v8  ;;  %v66_v8 = vld [vmem:[%s4177_s5 + $0x10] sm:$0xff] }
 0x746   :  { %v862_v9 = vpop.xlane.xlu0 %861 }
 0x747   :  { %v864_v11 = vsub.f32 %v854_v2, %v862_v9  ;;  %v859_v14 = vpop.xlane.xlu1 %858  ;;  %v67_v9 = vld [vmem:[%s4177_s5 + $0x18] sm:$0xff] }
 0x748   :  { %v863_v15 = vsub.f32 %v849_v4, %v859_v14  ;;  %v69_v14 = vld [vmem:[%s4179_s7] sm:$0xff] }
 0x749   :  { %v867_v16 = vmul.f32 1.442695, %v864_v11  ;;  %v3220_v11 = vpack.c.bf16 %v67_v9, %v66_v8 }
 0x74a   :  { %v865_v18 = vmul.f32 1.442695, %v863_v15  ;;  %v70_v15 = vld [vmem:[%s4179_s7 + $0x8] sm:$0xff] }
 0x74b   :  { %3441 = vpow2.f32 %v867_v16  ;;  %v71_v16 = vld [vmem:[%s4179_s7 + $0x10] sm:$0xff] }
 0x74c   :  { %3443 = vpow2.f32 %v865_v18  ;;  %v3224_v18 = vpack.c.bf16 %v70_v15, %v69_v14 }
 0x755   :  { %v3442_v19 = vpop.eup %3441 }
 0x756   :  { %v3444_v20 = vpop.eup %3443  ;;  %v872_v21 = vsel %vm256_vm3, %v3442_v19, 0.0 }
 0x757   :  { %873 = vadd.xlane.f32.xlu1 %v872_v21  ;;  %v869_v22 = vsel %vm256_vm3, %v3444_v20, 0.0  ;;  %v73_v21 = vld [vmem:[%s4179_s7 + $0x20] sm:$0xff] }
 0x758   :  { %870 = vadd.xlane.f32.xlu0 %v869_v22  ;;  %v74_v22 = vld [vmem:[%s4179_s7 + $0x28] sm:$0xff] }
 0x768   :  { %968 = vrot.lane.b32.xlu1 %v3749_v32, %s3557_s24 }
 0x76c   :  { %970 = vrot.lane.b32.xlu1 %v3747_v31, %s3557_s24 }
 0x76e   :  { %3373 = vrot.lane.b32.xlu0 %v3681_v13, %s3568_s11  ;;  %v60_v13 = vld [vmem:[%s4176_s4] sm:$0xff] }
 0x76f   :  { %v3208_v39 = vpack.c.bf16 %v61_v37, %v60_v13 }
 0x770   :  { %978 = vrot.lane.b32.xlu1 %v2996_v63, %s4186_s12 }
 0x772   :  { %976 = vrot.lane.b32.xlu0 %v757_v0, %s4186_s12 }
 0x7e4   :  { %v874_v23 = vpop.xlane.xlu1 %873 }
 0x7e5   :  { %3445 = vrcp.f32 %v874_v23  ;;  %v871_v24 = vpop.xlane.xlu0 %870  ;;  %v3232_v23 = vpack.c.bf16 %v74_v22, %v73_v21 }
 0x7e6   :  { %3447 = vrcp.f32 %v871_v24 }
 0x7e8   :  { %v969_v44 = vpop.permute.xlu1 %968 }
 0x7e9   :  { %v3374_v27 = vpop.permute.xlu0 %3373  ;;  %v990_v48 = vsel %vm172_vm1, %v3745_v30, %v969_v44  ;;  %v3816_v30 = vsub.s32 0, %v3813_v57 }
 0x7ea   :  { %v3376_v28 = vunpack.i.h.bf16 %v3374_v27  ;;  %v3375_v33 = vunpack.i.l.bf16 %v3374_v27 }
 0x7ec   :  { %v3204_v32 = vpack.c.bf16 %v3376_v28, %v3375_v33  ;;  %v971_v45 = vpop.permute.xlu1 %970 }
 0x7ed   :  { %v977_v47 = vpop.permute.xlu0 %976  ;;  %v991_v50 = vsel %vm172_vm1, %v3743_v29, %v971_v45  ;;  %v3821_v29 = vld [vmem:[%s4180_s8] sm:$0x3f] }
 0x7ee   :  { %3205 = vmatprep.subr.bf16.mxu0 %v3204_v32  ;;  %v992_v51 = vsel %vm256_vm3, %v990_v48, %v977_v47  ;;  %v1000_v58 = vrot.slane %v3821_v29, %v3816_v30 }
 0x7ef   :  { %v3446_v34 = vpop.eup %3445  ;;  %3207 = vmatpush3.bf16.msra.mxu0 %v3204_v32 }
 0x7f0   :  { %v3448_v31 = vpop.eup %3447  ;;  %v878_v36 = vmul.f32 %v3446_v34, %v3442_v19  ;;  %3209 = vmatprep.subr.bf16.mxu0 %v3208_v39  ;;  %v979_v46 = vpop.permute.xlu1 %978  ;;  %v72_v19 = vld [vmem:[%s4179_s7 + $0x18] sm:$0xff] }
 0x7f1   :  { %v877_v35 = vmul.f32 %v3448_v31, %v3444_v20  ;;  %v993_v53 = vsel %vm256_vm3, %v991_v50, %v979_v46  ;;  %v3228_v20 = vpack.c.bf16 %v72_v19, %v71_v16 }
 0x7f3   :  { %3008 = vmatprep.mubr.msk.f32.mxu0 %vm256_vm3, %v877_v35 }
 0x7f4   :  { %3009 = vmatmul.mubr.msk.f32.vlgmr.msra.gmra.mrb[6].mxu0 %vm256_vm3, %v878_v36 }
 0x7f5   :  { %3211 = vmatpush3.bf16.msra.mxu0 %v3208_v39 }
 0x7f6   :  { %3213 = vmatprep.subr.bf16.mxu0 %v3212_v41 }
 0x7f9   :  { %3215 = vmatpush3.bf16.msra.mxu0 %v3212_v41  ;;  %v1117_v41 = vsub.s32 2, %v3813_v57 }
 0x7fa   :  { %3225 = vmatprep.subr.bf16.mxu0 %v3224_v18 }
 0x7fb   :  { %v1118_v44 = vrot.slane %v3821_v29, %v1117_v41 }
 0x8c7   :  { %v3010_v42 = vpop.f32.mrb[6].mxu0 }
 0x8c8   :  { %986 = vrot.lane.b32.xlu1 %v3010_v42, %s4184_s13  ;;  %v957_v43 = vpop.f32.mrb[7].mxu0  ;;  %v1123_v42 = vsub.s32 3, %v3813_v57 }
 0x8c9   :  { %984 = vrot.lane.b32.xlu0 %v957_v43, %s4184_s13 }
 0x8ca   :  { %v1124_v47 = vrot.slane %v3821_v29, %v1123_v42 }
 0x93a   :  { %v987_v49 = vpop.permute.xlu1 %986 }
 0x93b   :  { %v985_v52 = vpop.permute.xlu0 %984  ;;  %v996_v55 = vsel %vm994_vm4, %v993_v53, %v987_v49 }
 0x93c   :  { %v995_v54 = vsel %vm994_vm4, %v992_v51, %v985_v52 }
 0x93d   :  { %3019 = vmatprep.mubr.msk.f32.mxu0 %vm84_vm0, %v995_v54 }
 0x93e   :  { %3020 = vmatmul.mubr.msk.f32.vlgmr.msra.gmra.mrb[8].mxu0 %vm84_vm0, %v996_v55  ;;  %v75_v55 = vld [vmem:[%s4179_s7 + $0x30] sm:$0xff] }
 0x93f   :  { %3227 = vmatpush3.bf16.msra.mxu0 %v3224_v18 }
 0x940   :  { %3229 = vmatprep.subr.bf16.mxu0 %v3228_v20 }
 0x943   :  { %3231 = vmatpush3.bf16.msra.mxu0 %v3228_v20 }
 0x944   :  { %3233 = vmatprep.subr.bf16.mxu0 %v3232_v23 }
 0x947   :  { %3235 = vmatpush3.bf16.msra.mxu0 %v3232_v23 }
 0xa11   :  { %v3021_v12 = vpop.f32.mrb[8].mxu0 }
 0xa12   :  { %v1079_v59 = vadd.f32 %v3021_v12, %v1000_v58  ;;  %v1073_v10 = vpop.f32.mrb[9].mxu0  ;;  %v2762_v12 = vld [vmem:[%s4178_s6] ss:$0 sm:$0xff] }
 0xa13   :  { %v1074_v60 = vadd.f32 %v1073_v10, %v1000_v58  ;;  %v3236_v58 = vpack.c.bf16 %v76_v56, %v75_v55 }
 0xa14   :  { %v3826_v61 = vadd.f32 %v1079_v59, %v3664_v7  ;;  %v65_v7 = vld [vmem:[%s4177_s5 + $0x8] sm:$0xff] }
 0xa15   :  { %v1082_v62 = vadd.f32 %v1074_v60, %v3657_v5  ;;  %v64_v5 = vld [vmem:[%s4177_s5] sm:$0xff]  ;;  %3237 = vmatprep.subr.bf16.mxu0 %v3236_v58 }
 0xa16   :  { %v1087_v63 = vsel %vm84_vm0, %v3826_v61, 0.0  ;;  %v1094_v3 = vmul.f32 %v3826_v61, %v3826_v61  ;;  %v3216_v6 = vpack.c.bf16 %v65_v7, %v64_v5  ;;  %3239 = vmatpush3.bf16.msra.mxu0 %v3236_v58  ;;  %v2768_v58 = vld [vmem:[%s4174_s2 + $0x28] sm:$0xff] }
 0xa17   :  { %1088 = vadd.xlane.f32.xlu1 %v1087_v63  ;;  %v1084_v0 = vsel %vm84_vm0, %v1082_v62, 0.0  ;;  %v1093_v1 = vmul.f32 %v1082_v62, %v1082_v62 }
 0xa18   :  { %1085 = vadd.xlane.f32.xlu0 %v1084_v0  ;;  %v1098_v4 = vsel %vm84_vm0, %v1094_v3, 0.0  ;;  %3217 = vmatprep.subr.bf16.mxu1 %v3216_v6  ;;  %v3889_v0 = vsub.s32 1, %v3813_v57 }
 0xa19   :  { %v1095_v2 = vsel %vm84_vm0, %v1093_v1, 0.0  ;;  %3219 = vmatpush3.bf16.msra.mxu1 %v3216_v6 }
 0xa1a   :  { %3221 = vmatprep.subr.bf16.mxu1 %v3220_v11  ;;  %v1219_v1 = vrot.slane %v3821_v29, %v3889_v0 }
 0xa1c   :  { %1096 = vadd.xlane.f32.xlu0 %v1095_v2 }
 0xa1d   :  { %3223 = vmatpush3.bf16.msra.mxu1 %v3220_v11 }
 0xa20   :  { %1099 = vadd.xlane.f32.xlu0 %v1098_v4 }
 0xaa4   :  { %v1089_v28 = vpop.xlane.xlu1 %1088 }
 0xaa5   :  { %v1086_v24 = vpop.xlane.xlu0 %1085  ;;  %v1092_v32 = vmul.f32 0.03125, %v1089_v28 }
 0xaa6   :  { %v1091_v27 = vmul.f32 0.03125, %v1086_v24 }
 0xaa7   :  { %v1104_v13 = vmul.f32 %v1092_v32, %v1092_v32  ;;  %v1108_v48 = vsub.f32 %v3826_v61, %v1092_v32 }
 0xaa8   :  { %v1103_v34 = vmul.f32 %v1091_v27, %v1091_v27  ;;  %v1107_v43 = vsub.f32 %v1082_v62, %v1091_v27 }
 0xaa9   :  { %v1097_v33 = vpop.xlane.xlu0 %1096 }
 0xaaa   :  { %v1101_v31 = vmul.f32 0.03125, %v1097_v33 }
 0xaac   :  { %v1105_v35 = vsub.f32 %v1101_v31, %v1103_v34 }
 0xaad   :  { %v1100_v36 = vpop.xlane.xlu0 %1099 }
 0xaae   :  { %v1109_v37 = vadd.f32 1e-05, %v1105_v35  ;;  %v1102_v38 = vmul.f32 0.03125, %v1100_v36  ;;  %v1336_v36 = vsub.s32 4, %v3813_v57 }
 0xab0   :  { %3449 = vrsqrt.f32 %v1109_v37  ;;  %v1106_v39 = vsub.f32 %v1102_v38, %v1104_v13  ;;  %v1342_v13 = vsub.s32 5, %v3813_v57  ;;  %v1337_v38 = vrot.slane %v3821_v29, %v1336_v36 }
 0xab2   :  { %v1110_v40 = vadd.f32 1e-05, %v1106_v39 }
 0xab4   :  { %3451 = vrsqrt.f32 %v1110_v40 }
 0xaba   :  { %v3450_v45 = vpop.eup %3449 }
 0xabb   :  { %v1113_v46 = vmul.f32 %v3450_v45, %v1107_v43  ;;  %v1343_v45 = vrot.slane %v3821_v29, %v1342_v13  ;;  %v2767_v29 = vld [vmem:[%s4174_s2 + $0x20] sm:$0xff] }
 0xabd   :  { %v1119_v49 = vmul.f32 %v1118_v44, %v1113_v46 }
 0xabe   :  { %v3452_v50 = vpop.eup %3451 }
 0xabf   :  { %v1114_v51 = vmul.f32 %v3452_v50, %v1108_v48  ;;  %v1125_v52 = vadd.f32 %v1124_v47, %v1119_v49 }
 0xac1   :  { %v1120_v53 = vmul.f32 %v1118_v44, %v1114_v51  ;;  %3030 = vmatprep.mubr.msk.f32.mxu1 %vm84_vm0, %v1125_v52 }
 0xac3   :  { %v1126_v54 = vadd.f32 %v1124_v47, %v1120_v53 }
 0xac5   :  { %3031 = vmatmul.mubr.msk.f32.vlgmr.msra.gmra.mrb[10].mxu1 %vm84_vm0, %v1126_v54 }
 0xb98   :  { %v3032_v59 = vpop.f32.mrb[10].mxu1 }
 0xb99   :  { %v1211_v10 = vadd.f32 %v3032_v59, %v2762_v12  ;;  %v1205_v60 = vpop.f32.mrb[11].mxu1  ;;  %v2769_v59 = vld [vmem:[%s4174_s2 + $0x30] sm:$0xff] }
 0xb9a   :  { %v1206_v61 = vadd.f32 %v2762_v12, %v1205_v60  ;;  %v3240_v12 = vpack.c.bf16 %v2768_v58, %v2767_v29 }
 0xb9b   :  { %v1215_v63 = vmax.f32 %v1211_v10, 0.0  ;;  %v2770_v10 = vld [vmem:[%s4174_s2 + $0x38] sm:$0xff] }
 0xb9c   :  { %v1214_v62 = vmax.f32 %v1206_v61, 0.0  ;;  %3241 = vmatprep.subr.bf16.mxu1 %v3240_v12  ;;  %v3244_v60 = vpack.c.bf16 %v2770_v10, %v2769_v59 }
 0xb9d   :  { %3243 = vmatpush3.bf16.msra.mxu1 %v3240_v12 }
 0xb9e   :  { %3049 = vmatprep.mubr.msk.f32.mxu0 %vm1220_vm5, %v1214_v62  ;;  %3245 = vmatprep.subr.bf16.mxu1 %v3244_v60 }
 0xb9f   :  { %3050 = vmatmul.mubr.msk.f32.vlgmr.msra.gmra.mrb[10].mxu0 %vm1220_vm5, %v1215_v63 }
 0xba1   :  { %3247 = vmatpush3.bf16.msra.mxu1 %v3244_v60 }
 0xc72   :  { %v3051_v2 = vpop.f32.mrb[10].mxu0 }
 0xc73   :  { %v1299_v3 = vadd.f32 %v3051_v2, %v1219_v1  ;;  %v1293_v4 = vpop.f32.mrb[11].mxu0 }
 0xc74   :  { %v1294_v5 = vadd.f32 %v1293_v4, %v1219_v1 }
 0xc75   :  { %v1303_v7 = vadd.f32 %v1299_v3, %v1126_v54 }
 0xc76   :  { %v1302_v6 = vadd.f32 %v1294_v5, %v1125_v52 }
 0xc77   :  { %v1307_v8 = vsel %vm84_vm0, %v1303_v7, 0.0  ;;  %v1313_v9 = vmul.f32 %v1303_v7, %v1303_v7 }
 0xc78   :  { %1308 = vadd.xlane.f32.xlu0 %v1307_v8  ;;  %v1304_v11 = vsel %vm84_vm0, %v1302_v6, 0.0  ;;  %v1312_v14 = vmul.f32 %v1302_v6, %v1302_v6 }
 0xc79   :  { %1305 = vadd.xlane.f32.xlu1 %v1304_v11  ;;  %v1317_v15 = vsel %vm84_vm0, %v1313_v9, 0.0 }
 0xc7a   :  { %v1314_v16 = vsel %vm84_vm0, %v1312_v14, 0.0 }
 0xc7c   :  { %1318 = vadd.xlane.f32.xlu0 %v1317_v15  ;;  %v54_v15 = vld [vmem:[%s4181_s9] sm:$0x3] }
 0xc7d   :  { %1315 = vadd.xlane.f32.xlu1 %v1314_v16  ;;  %v3925_v16 = vrot.slane %v54_v15, %v3816_v30 }
 0xd05   :  { %v1309_v18 = vpop.xlane.xlu0 %1308 }
 0xd06   :  { %v1311_v19 = vmul.f32 0.03125, %v1309_v18  ;;  %v1306_v20 = vpop.xlane.xlu1 %1305 }
 0xd07   :  { %v1310_v21 = vmul.f32 0.03125, %v1306_v20 }
 0xd08   :  { %v1323_v23 = vmul.f32 %v1311_v19, %v1311_v19  ;;  %v1327_v37 = vsub.f32 %v1303_v7, %v1311_v19 }
 0xd09   :  { %v1319_v22 = vpop.xlane.xlu0 %1318  ;;  %v1322_v28 = vmul.f32 %v1310_v21, %v1310_v21  ;;  %v1326_v40 = vsub.f32 %v1302_v6, %v1310_v21 }
 0xd0a   :  { %v1321_v24 = vmul.f32 0.03125, %v1319_v22  ;;  %v1316_v27 = vpop.xlane.xlu1 %1315 }
 0xd0b   :  { %v1320_v33 = vmul.f32 0.03125, %v1316_v27 }
 0xd0c   :  { %v1325_v32 = vsub.f32 %v1321_v24, %v1323_v23  ;;  %v3928_v23 = vrot.slane %v54_v15, %v3889_v0 }
 0xd0d   :  { %v1324_v34 = vsub.f32 %v1320_v33, %v1322_v28 }
 0xd0e   :  { %v1329_v31 = vadd.f32 1e-05, %v1325_v32 }
 0xd0f   :  { %v1328_v35 = vadd.f32 1e-05, %v1324_v34  ;;  %v2790_v34 = vld [vmem:[%s4175_s3 + $0x1] ss:$0 sm:$0xff]  ;;  %s4190_s3 = smov 16  }
 0xd10   :  { %3453 = vrsqrt.f32 %v1329_v31 }
 0xd11   :  { %3455 = vrsqrt.f32 %v1328_v35 }
 0xd1a   :  { %v3454_v39 = vpop.eup %3453 }
 0xd1b   :  { %v3456_v43 = vpop.eup %3455  ;;  %v1333_v44 = vmul.f32 %v3454_v39, %v1327_v37 }
 0xd1c   :  { %v1332_v46 = vmul.f32 %v3456_v43, %v1326_v40 }
 0xd1d   :  { %v1339_v47 = vmul.f32 %v1337_v38, %v1333_v44 }
 0xd1e   :  { %v1338_v48 = vmul.f32 %v1337_v38, %v1332_v46 }
 0xd1f   :  { %v1345_v49 = vadd.f32 %v1343_v45, %v1339_v47 }
 0xd20   :  { %v1344_v50 = vadd.f32 %v1343_v45, %v1338_v48 }
 0xd21   :  { %v1349_v51 = vsel %vm84_vm0, %v1345_v49, 0.0  ;;  %v1355_v52 = vmul.f32 %v1345_v49, %v1345_v49 }
 0xd22   :  { %1350 = vadd.xlane.f32.xlu0 %v1349_v51  ;;  %v1346_v53 = vsel %vm84_vm0, %v1344_v50, 0.0  ;;  %v1354_v54 = vmul.f32 %v1344_v50, %v1344_v50 }
 0xd23   :  { %1347 = vadd.xlane.f32.xlu1 %v1346_v53  ;;  %v1359_v55 = vsel %vm84_vm0, %v1355_v52, 0.0 }
 0xd24   :  { %v1356_v56 = vsel %vm84_vm0, %v1354_v54, 0.0 }
 0xd26   :  { %1360 = vadd.xlane.f32.xlu0 %v1359_v55 }
 0xd27   :  { %1357 = vadd.xlane.f32.xlu1 %v1356_v56 }
 0xdaf   :  { %v1351_v61 = vpop.xlane.xlu0 %1350 }
 0xdb0   :  { %v1353_v62 = vmul.f32 0.03125, %v1351_v61  ;;  %v1348_v63 = vpop.xlane.xlu1 %1347 }
 0xdb1   :  { %v1352_v1 = vmul.f32 0.03125, %v1348_v63 }
 0xdb2   :  { %v1365_v3 = vmul.f32 %v1353_v62, %v1353_v62  ;;  %v1369_v18 = vsub.f32 %v1345_v49, %v1353_v62 }
 0xdb3   :  { %v1361_v2 = vpop.xlane.xlu0 %1360  ;;  %v1364_v7 = vmul.f32 %v1352_v1, %v1352_v1  ;;  %v1368_v20 = vsub.f32 %v1344_v50, %v1352_v1 }
 0xdb4   :  { %v1363_v4 = vmul.f32 0.03125, %v1361_v2  ;;  %v1358_v5 = vpop.xlane.xlu1 %1357 }
 0xdb5   :  { %v1362_v6 = vmul.f32 0.03125, %v1358_v5 }
 0xdb6   :  { %v1367_v8 = vsub.f32 %v1363_v4, %v1365_v3 }
 0xdb7   :  { %v1366_v9 = vsub.f32 %v1362_v6, %v1364_v7 }
 0xdb8   :  { %v1371_v11 = vadd.f32 1e-05, %v1367_v8 }
 0xdb9   :  { %v1370_v14 = vadd.f32 1e-05, %v1366_v9 }
 0xdba   :  { %3457 = vrsqrt.f32 %v1371_v11 }
 0xdbb   :  { %3459 = vrsqrt.f32 %v1370_v14 }
 0xdc4   :  { %v3458_v19 = vpop.eup %3457 }
 0xdc5   :  { %v3460_v21 = vpop.eup %3459  ;;  %v1375_v22 = vmul.f32 %v3458_v19, %v1369_v18 }
 0xdc6   :  { %v1374_v24 = vmul.f32 %v3460_v21, %v1368_v20 }
 0xdc7   :  { %v1381_v27 = vmul.f32 %v3925_v16, %v1375_v22 }
 0xdc8   :  { %v1380_v28 = vmul.f32 %v3925_v16, %v1374_v24 }
 0xdc9   :  { %v3936_v32 = vadd.f32 %v3928_v23, %v1381_v27 }
 0xdca   :  { %v3933_v33 = vadd.f32 %v3928_v23, %v1380_v28 }
 0xdcc   :  { %3060 = vmatprep.mubr.msk.f32.mxu1 %vm84_vm0, %v3933_v33 }
 0xdcd   :  { %3061 = vmatmul.mubr.msk.f32.vlgmr.msra.gmra.mrb[12].mxu1 %vm84_vm0, %v3936_v32 }
 0xea0   :  { %v3062_v31 = vpop.f32.mrb[12].mxu1 }
 0xea1   :  { %v3945_v35 = vadd.f32 %v3062_v31, %v2790_v34  ;;  %v1496_v37 = vpop.f32.mrb[13].mxu1 }
 0xea2   :  { %v3947_v38 = vadd.f32 %v2790_v34, %v1496_v37 }
 0xea4   :  { %3067 = vmatprep.mubr.msk.f32.mxu1 %vm172_vm1, %v3947_v38  ;;  %v3953_v39 = vpack.i.bf16 %v3945_v35, %v3947_v38 }
 0xea6   :  { %3383 = vrot.lane.b32.xlu0 %v3953_v39, %s3560_s21  ;;  %3378 = vrot.lane.b32.xlu1 %v3953_v39, %s3559_s0 }
 0xeaa   :  { %1703 = vrot.lane.b32.xlu1 %v3947_v38, %s3558_s20 }
 0xeae   :  { %1705 = vrot.lane.b32.xlu1 %v3945_v35, %s3558_s20 }
 0xf18   :  { %v3384_v40 = vpop.permute.xlu0 %3383  ;;  %v3379_v43 = vpop.permute.xlu1 %3378 }
 0xf19   :  { %v3386_v44 = vunpack.i.h.bf16 %v3384_v40  ;;  %v3385_v45 = vunpack.i.l.bf16 %v3384_v40  ;;  %v3381_v46 = vunpack.i.h.bf16 %v3379_v43  ;;  %v3380_v47 = vunpack.i.l.bf16 %v3379_v43 }
 0xf1b   :  { %v3248_v48 = vpack.c.bf16 %v3381_v46, %v3380_v47  ;;  %v3258_v49 = vpack.c.bf16 %v3386_v44, %v3385_v45 }
 0xf1c   :  { %v1704_v50 = vpop.permute.xlu1 %1703 }
 0xf1d   :  { %3250 = vmatprep.subr.msk.bf16.mxu1 %vm3691_vm2, %v3248_v48 }
 0xf1e   :  { %3253 = vmatpush3.bf16.xpose.msk.msra.mxu1 %vm3691_vm2, %v3248_v48 }
 0xf1f   :  { %3260 = vmatprep.subr.msk.bf16.mxu1 %vm3691_vm2, %v3258_v49 }
 0xf20   :  { %v1706_v51 = vpop.permute.xlu1 %1705 }
 0xf25   :  { %3068 = vmatmul.mubr.msk.f32.vlgmr.msra.gmra.mrb[14].mxu1 %vm172_vm1, %v3945_v35 }
 0xf26   :  { %3263 = vmatpush3.bf16.xpose.msk.msra.mxu1 %vm3691_vm2, %v3258_v49  ;;  %3081 = vmatprep.mubr.msk.f32.mxu1 %vm172_vm1, %v1704_v50 }
 0xf2d   :  { %3082 = vmatmul.mubr.msk.f32.vlgmr.msra.gmra.mrb[16].mxu1 %vm172_vm1, %v1706_v51 }
 0xff8   :  { %v3069_v52 = vpop.f32.mrb[14].mxu1 }
 0xff9   :  { %v1591_v53 = vadd.f32 %v3069_v52, %v3707_v25  ;;  %v1585_v54 = vpop.f32.mrb[15].mxu1 }
 0xffa   :  { %v1586_v55 = vadd.f32 %v1585_v54, %v3709_v26 }
 0xffb   :  { %v1597_v56 = vsel %vm256_vm3, %v1591_v53, -inf }
 0xffc   :  { %1598 = vmax.xlane.f32.xlu1 %v1597_v56  ;;  %v1594_v29 = vsel %vm256_vm3, %v1586_v55, -inf }
 0xffd   :  { %1595 = vmax.xlane.f32.xlu0 %v1594_v29 }
0x1000   :  { %v3083_v58 = vpop.f32.mrb[16].mxu1 }
0x1001   :  { %v1785_v12 = vpop.f32.mrb[17].mxu1  ;;  %v1791_v10 = vadd.f32 %v3083_v58, %v3707_v25 }
0x1002   :  { %v1786_v59 = vadd.f32 %v1785_v12, %v3709_v26 }
0x1003   :  { %v1797_v61 = vsel %vm256_vm3, %v1791_v10, -inf }
0x1004   :  { %v1794_v60 = vsel %vm256_vm3, %v1786_v59, -inf }
0x1005   :  { %1795 = vmax.xlane.f32.xlu0 %v1794_v60 }
0x1009   :  { %1798 = vmax.xlane.f32.xlu0 %v1797_v61 }
0x100d   :  { %3388 = vrot.lane.b32.xlu1 %v3953_v39, %s3561_s22 }
0x1089   :  { %v1599_v62 = vpop.xlane.xlu1 %1598 }
0x108a   :  { %v1601_v63 = vsub.f32 %v1591_v53, %v1599_v62  ;;  %v1596_v1 = vpop.xlane.xlu0 %1595 }
0x108b   :  { %v1600_v2 = vsub.f32 %v1586_v55, %v1596_v1  ;;  %v3505_v1 = vld [vmem:[#allocation2 + $0x8] sm:$0xff] }
0x108c   :  { %v1604_v3 = vmul.f32 1.442695, %v1601_v63 }
0x108d   :  { %v1602_v4 = vmul.f32 1.442695, %v1600_v2  ;;  %v3389_v5 = vpop.permute.xlu1 %3388 }
0x108e   :  { %3461 = vpow2.f32 %v1604_v3  ;;  %v3391_v26 = vunpack.i.h.bf16 %v3389_v5  ;;  %v3390_v7 = vunpack.i.l.bf16 %v3389_v5 }
0x108f   :  { %3463 = vpow2.f32 %v1602_v4  ;;  %v3506_v4 = vld [vmem:[#allocation2] sm:$0xff] }
0x1090   :  { %v3254_v25 = vpack.c.bf16 %v3391_v26, %v3390_v7 }
0x1092   :  { %3255 = vmatprep.subr.bf16.mxu0 %v3254_v25  ;;  %v1796_v6 = vpop.xlane.xlu0 %1795 }
0x1093   :  { %3257 = vmatpush3.bf16.msra.mxu0 %v3254_v25  ;;  %v1800_v22 = vsub.f32 %v1786_v59, %v1796_v6 }
0x1095   :  { %v1802_v24 = vmul.f32 1.442695, %v1800_v22 }
0x1096   :  { %v1799_v8 = vpop.xlane.xlu0 %1798 }
0x1097   :  { %v1801_v9 = vsub.f32 %v1791_v10, %v1799_v8 }
0x1098   :  { %v3462_v11 = vpop.eup %3461 }
0x1099   :  { %v3464_v14 = vpop.eup %3463  ;;  %v1804_v15 = vmul.f32 1.442695, %v1801_v9  ;;  %v1609_v18 = vsel %vm256_vm3, %v3462_v11, 0.0 }
0x109a   :  { %1610 = vadd.xlane.f32.xlu0 %v1609_v18  ;;  %v1606_v19 = vsel %vm256_vm3, %v3464_v14, 0.0 }
0x109b   :  { %3465 = vpow2.f32 %v1804_v15  ;;  %1607 = vadd.xlane.f32.xlu1 %v1606_v19 }
0x109c   :  { %3467 = vpow2.f32 %v1802_v24 }
0x10a5   :  { %v3466_v20 = vpop.eup %3465 }
0x10a6   :  { %v1809_v21 = vsel %vm256_vm3, %v3466_v20, 0.0  ;;  %v3468_v27 = vpop.eup %3467 }
0x10a7   :  { %1810 = vadd.xlane.f32.xlu0 %v1809_v21  ;;  %v1806_v28 = vsel %vm256_vm3, %v3468_v27, 0.0 }
0x10ac   :  { %3398 = vrot.lane.b32.xlu1 %v3953_v39, %s3562_s25 }
0x10bd   :  { %3393 = vrot.lane.b32.xlu0 %v3953_v39, %s3563_s26 }
0x10c1   :  { %1905 = vrot.lane.b32.xlu0 %v3945_v35, %s3564_s27 }
0x10d0   :  { %1807 = vadd.xlane.f32.xlu1 %v1806_v28 }
0x10e1   :  { %1903 = vrot.lane.b32.xlu1 %v3947_v38, %s3564_s27 }
0x1127   :  { %v1611_v34 = vpop.xlane.xlu0 %1610 }
0x1128   :  { %3469 = vrcp.f32 %v1611_v34  ;;  %v1608_v31 = vpop.xlane.xlu1 %1607 }
0x1129   :  { %3471 = vrcp.f32 %v1608_v31 }
0x112c   :  { %v3399_v46 = vpop.permute.xlu1 %3398 }
0x112d   :  { %v3401_v48 = vunpack.i.h.bf16 %v3399_v46  ;;  %v3400_v49 = vunpack.i.l.bf16 %v3399_v46 }
0x112f   :  { %v3268_v53 = vpack.c.bf16 %v3401_v48, %v3400_v49 }
0x1132   :  { %v3470_v37 = vpop.eup %3469 }
0x1133   :  { %v3472_v40 = vpop.eup %3471  ;;  %v1615_v45 = vmul.f32 %v3470_v37, %v3462_v11 }
0x1134   :  { %v1811_v43 = vpop.xlane.xlu0 %1810  ;;  %v1614_v44 = vmul.f32 %v3472_v40, %v3464_v14 }
0x1135   :  { %3473 = vrcp.f32 %v1811_v43 }
0x1136   :  { %3074 = vmatprep.mubr.msk.f32.mxu0 %vm256_vm3, %v1614_v44 }
0x1137   :  { %3075 = vmatmul.mubr.msk.f32.vlgmr.msra.gmra.mrb[12].mxu0 %vm256_vm3, %v1615_v45 }
0x1138   :  { %v3394_v47 = vpop.permute.xlu0 %3393 }
0x1139   :  { %v3396_v50 = vunpack.i.h.bf16 %v3394_v47  ;;  %v3395_v51 = vunpack.i.l.bf16 %v3394_v47 }
0x113b   :  { %v3264_v52 = vpack.c.bf16 %v3396_v50, %v3395_v51 }
0x113c   :  { %v1906_v59 = vpop.permute.xlu0 %1905 }
0x113d   :  { %3265 = vmatprep.subr.bf16.mxu0 %v3264_v52 }
0x113e   :  { %3267 = vmatpush3.bf16.msra.mxu0 %v3264_v52 }
0x113f   :  { %3270 = vmatprep.subr.msk.bf16.mxu0 %vm3691_vm2, %v3268_v53  ;;  %v3474_v55 = vpop.eup %3473 }
0x1140   :  { %v1815_v58 = vmul.f32 %v3474_v55, %v3466_v20 }
0x115d   :  { %v1808_v54 = vpop.xlane.xlu1 %1807 }
0x115e   :  { %3475 = vrcp.f32 %v1808_v54 }
0x1161   :  { %v1904_v12 = vpop.permute.xlu1 %1903 }
0x1168   :  { %v3476_v56 = vpop.eup %3475 }
0x1169   :  { %v1814_v29 = vmul.f32 %v3476_v56, %v3468_v27 }
0x116b   :  { %3088 = vmatprep.mubr.msk.f32.mxu0 %vm256_vm3, %v1814_v29 }
0x116c   :  { %3089 = vmatmul.mubr.msk.f32.vlgmr.msra.gmra.mrb[14].mxu0 %vm256_vm3, %v1815_v58 }
0x116d   :  { %3273 = vmatpush3.bf16.xpose.msk.msra.mxu0 %vm3691_vm2, %v3268_v53  ;;  %3095 = vmatprep.mubr.msk.f32.mxu0 %vm172_vm1, %v1904_v12 }
0x1174   :  { %3096 = vmatmul.mubr.msk.f32.vlgmr.msra.gmra.mrb[16].mxu0 %vm172_vm1, %v1906_v59 }
0x120a   :  { %v4007_v10 = vpop.f32.mrb[12].mxu0 }
0x120b   :  { %v4009_v60 = vpop.f32.mrb[13].mxu0 }
0x123f   :  { %v4011_v61 = vpop.f32.mrb[14].mxu0 }
0x1240   :  { %v4013_v62 = vpop.f32.mrb[15].mxu0 }
0x1247   :  { %v3097_v63 = vpop.f32.mrb[16].mxu0 }
0x1248   :  { %v1991_v2 = vadd.f32 %v3505_v1, %v3097_v63  ;;  %v1985_v3 = vpop.f32.mrb[17].mxu0 }
0x1249   :  { %v1986_v5 = vadd.f32 %v3506_v4, %v1985_v3 }
0x124a   :  { %v1997_v26 = vsel %vm256_vm3, %v1991_v2, -inf }
0x124b   :  { %1998 = vmax.xlane.f32.xlu0 %v1997_v26  ;;  %v1994_v7 = vsel %vm256_vm3, %v1986_v5, -inf }
0x124c   :  { %1995 = vmax.xlane.f32.xlu1 %v1994_v7 }
0x12d8   :  { %v1999_v25 = vpop.xlane.xlu0 %1998 }
0x12d9   :  { %v2001_v6 = vsub.f32 %v1991_v2, %v1999_v25  ;;  %v1996_v8 = vpop.xlane.xlu1 %1995 }
0x12da   :  { %v2000_v9 = vsub.f32 %v1986_v5, %v1996_v8 }
0x12db   :  { %v2004_v11 = vmul.f32 1.442695, %v2001_v6 }
0x12dc   :  { %v2002_v14 = vmul.f32 1.442695, %v2000_v9 }
0x12dd   :  { %3477 = vpow2.f32 %v2004_v11  ;;  %v2773_v11 = vld [vmem:[%s4176_s4 + $0x28] sm:$0xff] }
0x12de   :  { %3479 = vpow2.f32 %v2002_v14  ;;  %v2774_v14 = vld [vmem:[%s4176_s4 + $0x30] sm:$0xff] }
0x12e7   :  { %v3478_v15 = vpop.eup %3477 }
0x12e8   :  { %v3480_v18 = vpop.eup %3479  ;;  %v2009_v19 = vsel %vm256_vm3, %v3478_v15, 0.0 }
0x12e9   :  { %2010 = vadd.xlane.f32.xlu1 %v2009_v19  ;;  %v2006_v20 = vsel %vm256_vm3, %v3480_v18, 0.0 }
0x12ea   :  { %2007 = vadd.xlane.f32.xlu0 %v2006_v20 }
0x12fa   :  { %3408 = vrot.lane.b32.xlu1 %v3953_v39, %s3565_s28 }
0x12fe   :  { %2103 = vrot.lane.b32.xlu1 %v3947_v38, %s3566_s29 }
0x1300   :  { %3403 = vrot.lane.b32.xlu0 %v3953_v39, %s3567_s30 }
0x1304   :  { %2105 = vrot.lane.b32.xlu0 %v3945_v35, %s3566_s29  ;;  %s4191_s29 = smov 24  }
0x1376   :  { %v2011_v21 = vpop.xlane.xlu1 %2010 }
0x1377   :  { %3481 = vrcp.f32 %v2011_v21  ;;  %v2008_v22 = vpop.xlane.xlu0 %2007 }
0x1378   :  { %3483 = vrcp.f32 %v2008_v22 }
0x137a   :  { %v3409_v24 = vpop.permute.xlu1 %3408 }
0x137b   :  { %v3404_v27 = vpop.permute.xlu0 %3403  ;;  %v3411_v28 = vunpack.i.h.bf16 %v3409_v24  ;;  %v3410_v34 = vunpack.i.l.bf16 %v3409_v24 }
0x137c   :  { %v3406_v31 = vunpack.i.h.bf16 %v3404_v27  ;;  %v3405_v37 = vunpack.i.l.bf16 %v3404_v27 }
0x137d   :  { %v3278_v43 = vpack.c.bf16 %v3411_v28, %v3410_v34 }
0x137e   :  { %v3274_v40 = vpack.c.bf16 %v3406_v31, %v3405_v37  ;;  %v2104_v46 = vpop.permute.xlu1 %2103 }
0x137f   :  { %v2106_v47 = vpop.permute.xlu0 %2105 }
0x1380   :  { %3275 = vmatprep.subr.bf16.mxu1 %v3274_v40 }
0x1381   :  { %v3482_v38 = vpop.eup %3481  ;;  %3277 = vmatpush3.bf16.msra.mxu1 %v3274_v40 }
0x1382   :  { %v3484_v44 = vpop.eup %3483  ;;  %3280 = vmatprep.subr.msk.bf16.mxu1 %vm3691_vm2, %v3278_v43  ;;  %v2015_v45 = vmul.f32 %v3482_v38, %v3478_v15 }
0x1383   :  { %v2014_v35 = vmul.f32 %v3484_v44, %v3480_v18  ;;  %v2775_v18 = vld [vmem:[%s4176_s4 + $0x38] sm:$0xff] }
0x1384   :  { %v3292_v19 = vpack.c.bf16 %v2775_v18, %v2774_v14 }
0x1385   :  { %3102 = vmatprep.mubr.msk.f32.mxu1 %vm256_vm3, %v2014_v35 }
0x1386   :  { %3103 = vmatmul.mubr.msk.f32.vlgmr.msra.gmra.mrb[18].mxu1 %vm256_vm3, %v2015_v45 }
0x1387   :  { %3109 = vmatprep.mubr.msk.f32.mxu1 %vm172_vm1, %v2104_v46 }
0x138a   :  { %3283 = vmatpush3.bf16.xpose.msk.msra.mxu1 %vm3691_vm2, %v3278_v43 }
0x1391   :  { %3110 = vmatmul.mubr.msk.f32.vlgmr.msra.gmra.mrb[20].mxu1 %vm172_vm1, %v2106_v47 }
0x1459   :  { %v3104_v48 = vpop.f32.mrb[18].mxu1 }
0x145a   :  { %v2094_v49 = vpop.f32.mrb[19].mxu1 }
0x1464   :  { %v3111_v50 = vpop.f32.mrb[20].mxu1 }
0x1465   :  { %v2191_v51 = vadd.f32 %v3505_v1, %v3111_v50  ;;  %v2185_v52 = vpop.f32.mrb[21].mxu1 }
0x1466   :  { %v2186_v53 = vadd.f32 %v3506_v4, %v2185_v52 }
0x1467   :  { %v2197_v54 = vsel %vm256_vm3, %v2191_v51, -inf }
0x1468   :  { %2198 = vmax.xlane.f32.xlu0 %v2197_v54  ;;  %v2194_v55 = vsel %vm256_vm3, %v2186_v53, -inf }
0x1469   :  { %2195 = vmax.xlane.f32.xlu1 %v2194_v55 }
0x14f5   :  { %v2199_v56 = vpop.xlane.xlu0 %2198 }
0x14f6   :  { %v2201_v29 = vsub.f32 %v2191_v51, %v2199_v56  ;;  %v2196_v58 = vpop.xlane.xlu1 %2195 }
0x14f7   :  { %v2200_v17 = vsub.f32 %v2186_v53, %v2196_v58  ;;  %v2779_v58 = vld [vmem:[%s4177_s5 + $0x38] sm:$0xff] }
0x14f8   :  { %v2204_v12 = vmul.f32 1.442695, %v2201_v29  ;;  %v2778_v29 = vld [vmem:[%s4177_s5 + $0x30] sm:$0xff] }
0x14f9   :  { %v2202_v59 = vmul.f32 1.442695, %v2200_v17  ;;  %v3300_v17 = vpack.c.bf16 %v2779_v58, %v2778_v29 }
0x14fa   :  { %3485 = vpow2.f32 %v2204_v12  ;;  %v2781_v12 = vld [vmem:[%s4179_s7 + $0x40] sm:$0xff] }
0x14fb   :  { %3487 = vpow2.f32 %v2202_v59  ;;  %v2782_v59 = vld [vmem:[%s4179_s7 + $0x48] sm:$0xff] }
0x1504   :  { %v3486_v63 = vpop.eup %3485 }
0x1505   :  { %v3488_v2 = vpop.eup %3487  ;;  %v2209_v1 = vsel %vm256_vm3, %v3486_v63, 0.0 }
0x1506   :  { %2210 = vadd.xlane.f32.xlu1 %v2209_v1  ;;  %v2206_v3 = vsel %vm256_vm3, %v3488_v2, 0.0  ;;  %v2784_v1 = vld [vmem:[%s4179_s7 + $0x58] sm:$0xff] }
0x1507   :  { %2207 = vadd.xlane.f32.xlu0 %v2206_v3 }
0x1517   :  { %2305 = vrot.lane.b32.xlu1 %v4013_v62, %s3557_s24 }
0x151b   :  { %2307 = vrot.lane.b32.xlu1 %v4011_v61, %s3557_s24 }
0x151d   :  { %3413 = vrot.lane.b32.xlu0 %v3953_v39, %s3568_s11  ;;  %v2772_v39 = vld [vmem:[%s4176_s4 + $0x20] sm:$0xff] }
0x151e   :  { %v3288_v15 = vpack.c.bf16 %v2773_v11, %v2772_v39 }
0x151f   :  { %2315 = vrot.lane.b32.xlu1 %v3104_v48, %s4190_s3 }
0x1521   :  { %2313 = vrot.lane.b32.xlu0 %v2094_v49, %s4190_s3 }
0x1593   :  { %v2211_v4 = vpop.xlane.xlu1 %2210 }
0x1594   :  { %3489 = vrcp.f32 %v2211_v4  ;;  %v2208_v5 = vpop.xlane.xlu0 %2207  ;;  %v2785_v4 = vld [vmem:[%s4179_s7 + $0x60] sm:$0xff] }
0x1595   :  { %3491 = vrcp.f32 %v2208_v5  ;;  %v2786_v5 = vld [vmem:[%s4179_s7 + $0x68] sm:$0xff] }
0x1597   :  { %v2306_v22 = vpop.permute.xlu1 %2305 }
0x1598   :  { %v3414_v26 = vpop.permute.xlu0 %3413  ;;  %v2327_v34 = vsel %vm172_vm1, %v4009_v60, %v2306_v22  ;;  %v4076_v60 = vld [vmem:[%s4180_s8 + $0x8] sm:$0x3f] }
0x1599   :  { %v3416_v7 = vunpack.i.h.bf16 %v3414_v26  ;;  %v3415_v25 = vunpack.i.l.bf16 %v3414_v26  ;;  %v3312_v26 = vpack.c.bf16 %v2786_v5, %v2785_v4  ;;  %v2453_v22 = vrot.slane %v4076_v60, %v1117_v41  ;;  %v2787_v41 = vld [vmem:[%s4179_s7 + $0x70] sm:$0xff] }
0x159b   :  { %v3284_v6 = vpack.c.bf16 %v3416_v7, %v3415_v25  ;;  %v2308_v24 = vpop.permute.xlu1 %2307 }
0x159c   :  { %v2314_v28 = vpop.permute.xlu0 %2313  ;;  %v2328_v37 = vsel %vm172_vm1, %v4007_v10, %v2308_v24  ;;  %v2336_v10 = vrot.slane %v4076_v60, %v3816_v30 }
0x159d   :  { %3285 = vmatprep.subr.bf16.mxu0 %v3284_v6  ;;  %v2329_v40 = vsel %vm256_vm3, %v2327_v34, %v2314_v28  ;;  %v2459_v28 = vrot.slane %v4076_v60, %v1123_v42 }
0x159e   :  { %v3490_v62 = vpop.eup %3489  ;;  %3287 = vmatpush3.bf16.msra.mxu0 %v3284_v6 }
0x159f   :  { %v3492_v8 = vpop.eup %3491  ;;  %v2215_v9 = vmul.f32 %v3490_v62, %v3486_v63  ;;  %3289 = vmatprep.subr.bf16.mxu0 %v3288_v15  ;;  %v2316_v27 = vpop.permute.xlu1 %2315  ;;  %v2783_v63 = vld [vmem:[%s4179_s7 + $0x50] sm:$0xff] }
0x15a0   :  { %v2214_v61 = vmul.f32 %v3492_v8, %v3488_v2  ;;  %v2330_v38 = vsel %vm256_vm3, %v2328_v37, %v2316_v27  ;;  %v3304_v2 = vpack.c.bf16 %v2782_v59, %v2781_v12  ;;  %v3308_v3 = vpack.c.bf16 %v2784_v1, %v2783_v63 }
0x15a2   :  { %3116 = vmatprep.mubr.msk.f32.mxu0 %vm256_vm3, %v2214_v61 }
0x15a3   :  { %3117 = vmatmul.mubr.msk.f32.vlgmr.msra.gmra.mrb[18].mxu0 %vm256_vm3, %v2215_v9 }
0x15a4   :  { %3291 = vmatpush3.bf16.msra.mxu0 %v3288_v15 }
0x15a5   :  { %3293 = vmatprep.subr.bf16.mxu0 %v3292_v19 }
0x15a8   :  { %3295 = vmatpush3.bf16.msra.mxu0 %v3292_v19 }
0x15a9   :  { %3305 = vmatprep.subr.bf16.mxu0 %v3304_v2 }
0x1676   :  { %v3118_v20 = vpop.f32.mrb[18].mxu0 }
0x1677   :  { %2323 = vrot.lane.b32.xlu1 %v3118_v20, %s4191_s29  ;;  %v2294_v21 = vpop.f32.mrb[19].mxu0 }
0x1678   :  { %2321 = vrot.lane.b32.xlu0 %v2294_v21, %s4191_s29 }
0x16e9   :  { %v2324_v31 = vpop.permute.xlu1 %2323 }
0x16ea   :  { %v2322_v43 = vpop.permute.xlu0 %2321  ;;  %v2332_v35 = vsel %vm994_vm4, %v2330_v38, %v2324_v31 }
0x16eb   :  { %v2331_v44 = vsel %vm994_vm4, %v2329_v40, %v2322_v43 }
0x16ec   :  { %3127 = vmatprep.mubr.msk.f32.mxu0 %vm84_vm0, %v2331_v44 }
0x16ed   :  { %3128 = vmatmul.mubr.msk.f32.vlgmr.msra.gmra.mrb[20].mxu0 %vm84_vm0, %v2332_v35  ;;  %v2788_v35 = vld [vmem:[%s4179_s7 + $0x78] sm:$0xff] }
0x16ee   :  { %3307 = vmatpush3.bf16.msra.mxu0 %v3304_v2  ;;  %v3316_v42 = vpack.c.bf16 %v2788_v35, %v2787_v41 }
0x16ef   :  { %3309 = vmatprep.subr.bf16.mxu0 %v3308_v3 }
0x16f2   :  { %3311 = vmatpush3.bf16.msra.mxu0 %v3308_v3 }
0x16f3   :  { %3313 = vmatprep.subr.bf16.mxu0 %v3312_v26 }
0x16f6   :  { %3315 = vmatpush3.bf16.msra.mxu0 %v3312_v26 }
0x16f7   :  { %3317 = vmatprep.subr.bf16.mxu0 %v3316_v42 }
0x16fa   :  { %3319 = vmatpush3.bf16.msra.mxu0 %v3316_v42 }
0x17c0   :  { %v3129_v45 = vpop.f32.mrb[20].mxu0 }
0x17c1   :  { %v2415_v46 = vadd.f32 %v3129_v45, %v2336_v10  ;;  %v2409_v47 = vpop.f32.mrb[21].mxu0 }
0x17c2   :  { %v2410_v48 = vadd.f32 %v2409_v47, %v2336_v10  ;;  %v2819_v10 = vld [vmem:[%s4178_s6 + $0x1] ss:$0 sm:$0xff]  ;;  %s3571_s6 = smov [#allocation5]  }
0x17c3   :  { %v2419_v49 = vadd.f32 %v2415_v46, %v3936_v32  ;;  %v2776_v32 = vld [vmem:[%s4177_s5 + $0x20] sm:$0xff]  ;;  %s2721_s7 = sshll.u32 %s3571_s6, 4  ;;  %s2722_s7 = int_to_ptr.vmem [resolvable:$true] %s2721_s7 }
0x17c4   :  { %v2418_v50 = vadd.f32 %v2410_v48, %v3933_v33  ;;  %v2777_v33 = vld [vmem:[%s4177_s5 + $0x28] sm:$0xff]  ;;  %s3529_s30 = scalar_lea.vmem %s2722_s7, 256  ;;  %p3534_p9 = scmp.lt.s32.totalorder %s2722_s7, %s2722_s7 }
0x17c5   :  { %v2423_v51 = vsel %vm84_vm0, %v2419_v49, 0.0  ;;  %v2429_v55 = vmul.f32 %v2419_v49, %v2419_v49  ;;  %v3296_v56 = vpack.c.bf16 %v2777_v33, %v2776_v32  ;;  %p3530_p8 = scmp.ne.s32.totalorder %s2722_s7, %s3529_s30  ;;  %p3535_p10 = scmp.lt.s32.totalorder %s3529_s30, %s3529_s30 }
0x17c6   :  { %2424 = vadd.xlane.f32.xlu1 %v2423_v51  ;;  %v2420_v52 = vsel %vm84_vm0, %v2418_v50, 0.0  ;;  %v2428_v53 = vmul.f32 %v2418_v50, %v2418_v50  ;;  %v2554_v51 = vrot.slane %v4076_v60, %v3889_v0 }
0x17c7   :  { %2421 = vadd.xlane.f32.xlu0 %v2420_v52  ;;  %v2433_v30 = vsel %vm84_vm0, %v2429_v55, 0.0  ;;  %3297 = vmatprep.subr.bf16.mxu1 %v3296_v56  ;;  %p3536_p11 = por %p3535_p10, %p3534_p9 }
0x17c8   :  { %v2430_v54 = vsel %vm84_vm0, %v2428_v53, 0.0  ;;  %3299 = vmatpush3.bf16.msra.mxu1 %v3296_v56 }
0x17c9   :  { %3301 = vmatprep.subr.bf16.mxu1 %v3300_v17  ;;  %p3537_p12 = pnand %p3536_p11, %p3530_p8 }
0x17cb   :  { %2431 = vadd.xlane.f32.xlu0 %v2430_v54 }
0x17cc   :  { %3303 = vmatpush3.bf16.msra.mxu1 %v3300_v17 }
0x17cf   :  { %2434 = vadd.xlane.f32.xlu0 %v2433_v30 }
0x1853   :  { %v2425_v6 = vpop.xlane.xlu1 %2424 }
0x1854   :  { %v2422_v7 = vpop.xlane.xlu0 %2421  ;;  %v2427_v8 = vmul.f32 0.03125, %v2425_v6 }
0x1855   :  { %v2426_v25 = vmul.f32 0.03125, %v2422_v7 }
0x1856   :  { %v2439_v14 = vmul.f32 %v2427_v8, %v2427_v8  ;;  %v2443_v34 = vsub.f32 %v2419_v49, %v2427_v8 }
0x1857   :  { %v2438_v61 = vmul.f32 %v2426_v25, %v2426_v25  ;;  %v2442_v21 = vsub.f32 %v2418_v50, %v2426_v25 }
0x1858   :  { %v2432_v62 = vpop.xlane.xlu0 %2431 }
0x1859   :  { %v2436_v9 = vmul.f32 0.03125, %v2432_v62 }
0x185b   :  { %v2440_v39 = vsub.f32 %v2436_v9, %v2438_v61  ;;  %v2671_v9 = vrot.slane %v4076_v60, %v1336_v36 }
0x185c   :  { %v2435_v11 = vpop.xlane.xlu0 %2434 }
0x185d   :  { %v2444_v15 = vadd.f32 1e-05, %v2440_v39  ;;  %v2437_v18 = vmul.f32 0.03125, %v2435_v11 }
0x185f   :  { %3493 = vrsqrt.f32 %v2444_v15  ;;  %v2441_v19 = vsub.f32 %v2437_v18, %v2439_v14  ;;  %v2677_v18 = vrot.slane %v4076_v60, %v1342_v13 }
0x1861   :  { %v2445_v20 = vadd.f32 1e-05, %v2441_v19 }
0x1863   :  { %3495 = vrsqrt.f32 %v2445_v20 }
0x1869   :  { %v3494_v24 = vpop.eup %3493 }
0x186a   :  { %v2448_v27 = vmul.f32 %v3494_v24, %v2442_v21 }
0x186c   :  { %v2454_v31 = vmul.f32 %v2453_v22, %v2448_v27 }
0x186d   :  { %v3496_v37 = vpop.eup %3495 }
0x186e   :  { %v2449_v40 = vmul.f32 %v3496_v37, %v2443_v34  ;;  %v2460_v43 = vadd.f32 %v2459_v28, %v2454_v31 }
0x1870   :  { %v2455_v38 = vmul.f32 %v2453_v22, %v2449_v40  ;;  %3138 = vmatprep.mubr.msk.f32.mxu1 %vm84_vm0, %v2460_v43 }
0x1872   :  { %v2461_v44 = vadd.f32 %v2459_v28, %v2455_v38 }
0x1874   :  { %3139 = vmatmul.mubr.msk.f32.vlgmr.msra.gmra.mrb[22].mxu1 %vm84_vm0, %v2461_v44 }
0x1947   :  { %v3140_v45 = vpop.f32.mrb[22].mxu1 }
0x1948   :  { %v2546_v46 = vadd.f32 %v3140_v45, %v2819_v10  ;;  %v2540_v47 = vpop.f32.mrb[23].mxu1 }
0x1949   :  { %v2541_v48 = vadd.f32 %v2819_v10, %v2540_v47 }
0x194a   :  { %v2550_v50 = vmax.f32 %v2546_v46, 0.0 }
0x194b   :  { %v2549_v49 = vmax.f32 %v2541_v48, 0.0 }
0x194d   :  { %3157 = vmatprep.mubr.msk.f32.mxu0 %vm1220_vm5, %v2549_v49 }
0x194e   :  { %3158 = vmatmul.mubr.msk.f32.vlgmr.msra.gmra.mrb[22].mxu0 %vm1220_vm5, %v2550_v50 }
0x1a21   :  { %v3159_v52 = vpop.f32.mrb[22].mxu0 }
0x1a22   :  { %v2633_v53 = vadd.f32 %v3159_v52, %v2554_v51  ;;  %v2627_v54 = vpop.f32.mrb[23].mxu0 }
0x1a23   :  { %v2628_v55 = vadd.f32 %v2627_v54, %v2554_v51 }
0x1a24   :  { %v2637_v30 = vadd.f32 %v2633_v53, %v2461_v44 }
0x1a25   :  { %v2636_v32 = vadd.f32 %v2628_v55, %v2460_v43 }
0x1a26   :  { %v2641_v33 = vsel %vm84_vm0, %v2637_v30, 0.0  ;;  %v2647_v56 = vmul.f32 %v2637_v30, %v2637_v30 }
0x1a27   :  { %2642 = vadd.xlane.f32.xlu0 %v2641_v33  ;;  %v2638_v29 = vsel %vm84_vm0, %v2636_v32, 0.0  ;;  %v2646_v58 = vmul.f32 %v2636_v32, %v2636_v32 }
0x1a28   :  { %2639 = vadd.xlane.f32.xlu1 %v2638_v29  ;;  %v2651_v17 = vsel %vm84_vm0, %v2647_v56, 0.0 }
0x1a29   :  { %v2648_v12 = vsel %vm84_vm0, %v2646_v58, 0.0 }
0x1a2b   :  { %2652 = vadd.xlane.f32.xlu0 %v2651_v17 }
0x1a2c   :  { %2649 = vadd.xlane.f32.xlu1 %v2648_v12 }
0x1ab4   :  { %v2643_v0 = vpop.xlane.xlu0 %2642 }
0x1ab5   :  { %v2645_v59 = vmul.f32 0.03125, %v2643_v0  ;;  %v2640_v63 = vpop.xlane.xlu1 %2639 }
0x1ab6   :  { %v2644_v2 = vmul.f32 0.03125, %v2640_v63 }
0x1ab7   :  { %v2657_v3 = vmul.f32 %v2645_v59, %v2645_v59  ;;  %v2661_v61 = vsub.f32 %v2637_v30, %v2645_v59 }
0x1ab8   :  { %v2653_v1 = vpop.xlane.xlu0 %2652  ;;  %v2656_v26 = vmul.f32 %v2644_v2, %v2644_v2  ;;  %v2660_v11 = vsub.f32 %v2636_v32, %v2644_v2 }
0x1ab9   :  { %v2655_v4 = vmul.f32 0.03125, %v2653_v1  ;;  %v2650_v5 = vpop.xlane.xlu1 %2649 }
0x1aba   :  { %v2654_v7 = vmul.f32 0.03125, %v2650_v5 }
0x1abb   :  { %v2659_v25 = vsub.f32 %v2655_v4, %v2657_v3 }
0x1abc   :  { %v2658_v6 = vsub.f32 %v2654_v7, %v2656_v26 }
0x1abd   :  { %v2663_v62 = vadd.f32 1e-05, %v2659_v25 }
0x1abe   :  { %v2662_v8 = vadd.f32 1e-05, %v2658_v6 }
0x1abf   :  { %3497 = vrsqrt.f32 %v2663_v62 }
0x1ac0   :  { %3499 = vrsqrt.f32 %v2662_v8 }
0x1ac9   :  { %v3498_v39 = vpop.eup %3497 }
0x1aca   :  { %v3500_v14 = vpop.eup %3499  ;;  %v2667_v15 = vmul.f32 %v3498_v39, %v2661_v61 }
0x1acb   :  { %v2666_v19 = vmul.f32 %v3500_v14, %v2660_v11 }
0x1acc   :  { %v2673_v20 = vmul.f32 %v2671_v9, %v2667_v15 }
0x1acd   :  { %v2672_v21 = vmul.f32 %v2671_v9, %v2666_v19 }
0x1ace   :  { %v2679_v22 = vadd.f32 %v2677_v18, %v2673_v20 }
0x1acf   :  { %v2678_v24 = vadd.f32 %v2677_v18, %v2672_v21 }
0x1ad0   :  { %v2683_v27 = vsel %vm84_vm0, %v2679_v22, 0.0  ;;  %v2689_v28 = vmul.f32 %v2679_v22, %v2679_v22 }
0x1ad1   :  { %2684 = vadd.xlane.f32.xlu0 %v2683_v27  ;;  %v2680_v34 = vsel %vm84_vm0, %v2678_v24, 0.0  ;;  %v2688_v36 = vmul.f32 %v2678_v24, %v2678_v24 }
0x1ad2   :  { %2681 = vadd.xlane.f32.xlu1 %v2680_v34  ;;  %v2693_v31 = vsel %vm84_vm0, %v2689_v28, 0.0 }
0x1ad3   :  { %v2690_v57 = vsel %vm84_vm0, %v2688_v36, 0.0 }
0x1ad5   :  { %2694 = vadd.xlane.f32.xlu0 %v2693_v31 }
0x1ad6   :  { %2691 = vadd.xlane.f32.xlu1 %v2690_v57 }
0x1b5e   :  { %v2685_v13 = vpop.xlane.xlu0 %2684 }
0x1b5f   :  { %v2687_v60 = vmul.f32 0.03125, %v2685_v13  ;;  %v2682_v37 = vpop.xlane.xlu1 %2681 }
0x1b60   :  { %v2686_v40 = vmul.f32 0.03125, %v2682_v37 }
0x1b61   :  { %v2699_v38 = vmul.f32 %v2687_v60, %v2687_v60  ;;  %v2703_v48 = vsub.f32 %v2679_v22, %v2687_v60 }
0x1b62   :  { %v2695_v43 = vpop.xlane.xlu0 %2694  ;;  %v2698_v35 = vmul.f32 %v2686_v40, %v2686_v40  ;;  %v2702_v50 = vsub.f32 %v2678_v24, %v2686_v40 }
0x1b63   :  { %v2697_v44 = vmul.f32 0.03125, %v2695_v43  ;;  %v2692_v41 = vpop.xlane.xlu1 %2691 }
0x1b64   :  { %v2696_v42 = vmul.f32 0.03125, %v2692_v41 }
0x1b65   :  { %v2701_v10 = vsub.f32 %v2697_v44, %v2699_v38 }
0x1b66   :  { %v2700_v45 = vsub.f32 %v2696_v42, %v2698_v35 }
0x1b67   :  { %v2705_v46 = vadd.f32 1e-05, %v2701_v10 }
0x1b68   :  { %v2704_v47 = vadd.f32 1e-05, %v2700_v45 }
0x1b69   :  { %3501 = vrsqrt.f32 %v2705_v46 }
0x1b6a   :  { %3503 = vrsqrt.f32 %v2704_v47 }
0x1b73   :  { %v3502_v49 = vpop.eup %3501 }
0x1b74   :  { %v3504_v51 = vpop.eup %3503  ;;  %v2709_v52 = vmul.f32 %v3502_v49, %v2703_v48 }
0x1b75   :  { %v2708_v53 = vmul.f32 %v3504_v51, %v2702_v50 }
0x1b76   :  { %v2711_v54 = vmul.f32 %v2709_v52, %v3925_v16 }
0x1b77   :  { %v2710_v55 = vmul.f32 %v2708_v53, %v3925_v16 }
0x1b78   :  { %v2713_v30 = vadd.f32 %v2711_v54, %v3928_v23 }
0x1b79   :  { %v2712_v32 = vadd.f32 %v2710_v55, %v3928_v23 }
0x1b7a   :  { %2715 = vst.msk [vmem:[#allocation5 + $0x8] sm:$0xff] %vm84_vm0, %v2713_v30 }
0x1b7b   :  { %2714 = vst.msk [vmem:[#allocation5] sm:$0xff] %vm84_vm0, %v2712_v32 }
0x1b7c   :  { %3540 = shalt.err (!%p3537_p12)
}
0x1b7d   :  { %s3541_s23 = scalar_lea.hbm %s4182_s10, 256 }
0x1b7e   :  { %p3542_p13 = scmp.ne.s32.totalorder %s4182_s10, %s3541_s23  ;;  %p3545_p0 = scmp.lt.u32.totalorder %s3541_s23, %s4182_s10 }
0x1b80   :  { %p3547_p1 = pnand %p3545_p0, %p3542_p13 }
0x1b82   :  { %3550 = shalt.err (!%p3547_p1)
}
0x1b83   :  { %s4192_s13 = smov 128  }
0x1b84   :  { %2727 = dma.vmem_to_hbm [thread:$0]  %s2722_s7, 256, %s4182_s10, [#allocation4], %s4192_s13, %s4192_s13, %s3557_s24  }
0x1b85   :  { %3553 = dma.done.wait [#allocation4], 256  }
0x1b86   :  { %3554 = vsyncadd [#allocation4], 4294967040 }
0x1b87   :  { %2731 = vsyncpa [#allocation3], 1 }
0x1b88   :  { %2732 = vsyncpa [#allocation4], 1 }

</bundles_post_ra>
